<compile_context>
chip_gen: v7x
topology: tpu7x:2x2x1
jax: 0.10.0
libtpu: 0.0.40
codegen_flags: <defaults>
</compile_context>

<pallas_src>
import functools
import math

import jax
import jax.numpy as jnp
from jax import lax
from jax.experimental import pallas as pl
from jax.experimental.pallas import tpu as pltpu


def _round_up(x, m):
    return ((x + m - 1) // m) * m


def _residual_layernorm_kernel(x_ref, res_ref, gamma_ref, beta_ref, out_ref, *,
                               eps, inv_d):
    # x_ref/res_ref/out_ref: (TN, D); gamma_ref/beta_ref: (1, D) float32.
    h = x_ref[...].astype(jnp.float32) + res_ref[...].astype(jnp.float32)  # residual
    mean = jnp.sum(h, axis=-1, keepdims=True) * inv_d                      # (TN, 1)
    c = h - mean
    var = jnp.sum(c * c, axis=-1, keepdims=True) * inv_d                   # (TN, 1)
    inv = lax.rsqrt(var + eps)                                             # EUP
    y = c * inv * gamma_ref[...] + beta_ref[...]
    out_ref[...] = y.astype(out_ref.dtype)


def _choose_tile_rows(n, d, itemsize, *, max_rows=1024,
                      vmem_budget_bytes=8 * 1024 * 1024):
    """Pick a sublane-aligned row tile bounded by a VMEM budget.

    Per grid step Pallas double-buffers x, res_x and the output tile, so the
    live-block footprint is ~ 2 * 3 * tn * d * itemsize bytes.
    """
    bytes_per_row = 2 * 3 * d * itemsize
    tn = vmem_budget_bytes // max(bytes_per_row, 1)
    tn = min(tn, max_rows, _round_up(n, 8))
    tn = max(8, (tn // 8) * 8)
    return tn


def fused_residual_layer_norm(x, res_x, gamma, beta, *, eps=1e-5):
    """LayerNorm(x + res_x) over the last dim, fused in a single Pallas kernel."""
    orig_shape = x.shape
    D = orig_shape[-1]
    N = math.prod(orig_shape[:-1])

    x2 = x.reshape(N, D)
    r2 = res_x.reshape(N, D).astype(x.dtype)

    itemsize = jnp.dtype(x.dtype).itemsize
    tn = _choose_tile_rows(N, D, itemsize)
    n_pad = _round_up(N, tn)
    if n_pad != N:
        pad = n_pad - N
        x2 = jnp.pad(x2, ((0, pad), (0, 0)))
        r2 = jnp.pad(r2, ((0, pad), (0, 0)))

    # Grid-invariant affine params, pre-cast so the kernel does no per-tile casts.
    gamma2 = gamma.reshape(1, D).astype(jnp.float32)
    beta2 = beta.reshape(1, D).astype(jnp.float32)

    grid = (n_pad // tn,)
    kernel = functools.partial(_residual_layernorm_kernel,
                               eps=float(eps), inv_d=float(1.0 / D))

    cost = pl.CostEstimate(
        flops=8 * n_pad * D,                     # add, center, square, affine, sums
        transcendentals=n_pad,                   # one rsqrt per row
        bytes_accessed=(3 * n_pad * D) * itemsize + 2 * D * 4,
    )

    out = pl.pallas_call(
        kernel,
        out_shape=jax.ShapeDtypeStruct((n_pad, D), x.dtype),
        grid_spec=pltpu.PrefetchScalarGridSpec(
            num_scalar_prefetch=0,
            grid=grid,
            in_specs=[
                pl.BlockSpec((tn, D), lambda i: (i, 0)),   # x tile
                pl.BlockSpec((tn, D), lambda i: (i, 0)),   # res_x tile
                pl.BlockSpec((1, D), lambda i: (0, 0)),    # gamma (grid-invariant)
                pl.BlockSpec((1, D), lambda i: (0, 0)),    # beta  (grid-invariant)
            ],
            out_specs=pl.BlockSpec((tn, D), lambda i: (i, 0)),
        ),
        compiler_params=pltpu.CompilerParams(
            dimension_semantics=("parallel",),             # split tiles across TCs
            vmem_limit_bytes=64 * 1024 * 1024,
        ),
        cost_estimate=cost,
    )(x2, r2, gamma2, beta2)

    if n_pad != N:
        out = out[:N]
    return out.reshape(orig_shape)


def residual_layer_norm_module(x, submodule_fn, gamma, beta, mask=None, y=None,
                               eps=1e-5):
    """Mirror of ResidualLayerNormModule.forward."""
    # TODO(synk): the wrapped submodule is an arbitrary nn.Module (attention /
    # FFN / ...); it is evaluated in plain JAX here — only the residual add +
    # LayerNorm is fused into the Pallas kernel.
    if y is not None:
        res_x = submodule_fn(x, y, mask)
    elif mask is not None:
        res_x = submodule_fn(x, mask)
    else:
        res_x = submodule_fn(x)
    return fused_residual_layer_norm(x, res_x, gamma, beta, eps=eps)


def reference(x, res_x, gamma, beta, eps=1e-5):
    h = x + res_x
    mean = jnp.mean(h, axis=-1, keepdims=True)
    var = jnp.mean((h - mean) ** 2, axis=-1, keepdims=True)
    return (h - mean) / jnp.sqrt(var + eps) * gamma + beta


if __name__ == "__main__":
    key = jax.random.PRNGKey(0)

    # Small shapes: batch=2, seq=256, hidden=128 (lane-dense output stores).
    B, T, D = 2, 256, 128
    k_x, k_w, k_b = jax.random.split(key, 3)

    x = jax.random.normal(k_x, (B, T, D), jnp.float32)

    # Example submodule (input_size = D): a simple linear projection in plain JAX.
    W = jax.random.normal(k_w, (D, D), jnp.float32) * (1.0 / math.sqrt(D))
    b_sub = jax.random.normal(k_b, (D,), jnp.float32) * 0.02
    submodule = lambda h: jnp.dot(h, W) + b_sub

    # LayerNorm params: PyTorch default init (weight = 1, bias = 0), eps = 1e-5.
    gamma = jnp.ones((D,), jnp.float32)
    beta = jnp.zeros((D,), jnp.float32)

    out = residual_layer_norm_module(x, submodule, gamma, beta)
    out = jax.block_until_ready(out)

    ref = reference(x, submodule(x), gamma, beta)
    assert out.shape == (B, T, D)
    assert jnp.allclose(out, ref, atol=1e-4, rtol=1e-4), "mismatch vs reference"

    print("KERNEL_OK")
</pallas_src>

<mosaic_0001>
module attributes {stable_mosaic.version = 11 : i64} {
  func.func @_residual_layernorm_kernel(%arg0: i32, %arg1: memref<512x128xf32, #tpu.memory_space<vmem>>, %arg2: memref<512x128xf32, #tpu.memory_space<vmem>>, %arg3: memref<1x128xf32, #tpu.memory_space<vmem>>, %arg4: memref<1x128xf32, #tpu.memory_space<vmem>>, %arg5: memref<512x128xf32, #tpu.memory_space<vmem>>) attributes {dimension_semantics = [#tpu.dimension_semantics<parallel>], iteration_bounds = array<i64: 1>, scalar_prefetch = 0 : i64, scratch_operands = 0 : i64, tpu.core_type = #tpu.core_type<tc>, window_params = [{transform_indices = @transform_0, window_bounds = array<i64: 512, 128>}, {transform_indices = @transform_1, window_bounds = array<i64: 512, 128>}, {pipeline_mode = #tpu.pipeline_mode<synchronous>, transform_indices = @transform_2, window_bounds = array<i64: 1, 128>}, {pipeline_mode = #tpu.pipeline_mode<synchronous>, transform_indices = @transform_3, window_bounds = array<i64: 1, 128>}, {transform_indices = @transform_4, window_bounds = array<i64: 512, 128>}]} {
    %c0 = arith.constant 0 : index
    %c0_0 = arith.constant 0 : index
    %0 = vector.load %arg1[%c0, %c0_0] : memref<512x128xf32, #tpu.memory_space<vmem>>, vector<512x128xf32>
    %c0_1 = arith.constant 0 : index
    %c0_2 = arith.constant 0 : index
    %1 = vector.load %arg2[%c0_1, %c0_2] : memref<512x128xf32, #tpu.memory_space<vmem>>, vector<512x128xf32>
    %2 = arith.addf %0, %1 : vector<512x128xf32>
    %cst = arith.constant dense<0.000000e+00> : vector<512xf32>
    %3 = vector.multi_reduction <add>, %2, %cst [1] : vector<512x128xf32> to vector<512xf32>
    %4 = vector.shape_cast %3 : vector<512xf32> to vector<512x1xf32>
    %cst_3 = arith.constant 7.812500e-03 : f32
    %5 = vector.broadcast %cst_3 : f32 to vector<512x1xf32>
    %6 = arith.mulf %4, %5 : vector<512x1xf32>
    %7 = vector.broadcast %6 : vector<512x1xf32> to vector<512x128xf32>
    %8 = arith.subf %2, %7 : vector<512x128xf32>
    %9 = arith.mulf %8, %8 : vector<512x128xf32>
    %cst_4 = arith.constant dense<0.000000e+00> : vector<512xf32>
    %10 = vector.multi_reduction <add>, %9, %cst_4 [1] : vector<512x128xf32> to vector<512xf32>
    %11 = vector.shape_cast %10 : vector<512xf32> to vector<512x1xf32>
    %cst_5 = arith.constant 7.812500e-03 : f32
    %12 = vector.broadcast %cst_5 : f32 to vector<512x1xf32>
    %13 = arith.mulf %11, %12 : vector<512x1xf32>
    %cst_6 = arith.constant 9.99999974E-6 : f32
    %14 = vector.broadcast %cst_6 : f32 to vector<512x1xf32>
    %15 = arith.addf %13, %14 : vector<512x1xf32>
    %16 = math.rsqrt %15 : vector<512x1xf32>
    %17 = vector.broadcast %16 : vector<512x1xf32> to vector<512x128xf32>
    %18 = arith.mulf %8, %17 : vector<512x128xf32>
    %c0_7 = arith.constant 0 : index
    %c0_8 = arith.constant 0 : index
    %19 = vector.load %arg3[%c0_7, %c0_8] : memref<1x128xf32, #tpu.memory_space<vmem>>, vector<1x128xf32>
    %20 = vector.broadcast %19 : vector<1x128xf32> to vector<512x128xf32>
    %21 = arith.mulf %18, %20 : vector<512x128xf32>
    %c0_9 = arith.constant 0 : index
    %c0_10 = arith.constant 0 : index
    %22 = vector.load %arg4[%c0_9, %c0_10] : memref<1x128xf32, #tpu.memory_space<vmem>>, vector<1x128xf32>
    %23 = vector.broadcast %22 : vector<1x128xf32> to vector<512x128xf32>
    %24 = arith.addf %21, %23 : vector<512x128xf32>
    %c0_11 = arith.constant 0 : index
    %c0_12 = arith.constant 0 : index
    %25 = vector.load %arg5[%c0_11, %c0_12] : memref<512x128xf32, #tpu.memory_space<vmem>>, vector<512x128xf32>
    tpu.vector_store %arg5[%c0_11, %c0_12], %24 {strides = array<i32>} : memref<512x128xf32, #tpu.memory_space<vmem>>, vector<512x128xf32>,
    return
  }
  func.func @transform_0(%arg0: i32) -> (i32, i32) {
    %c0_i32 = arith.constant 0 : i32
    %c0_i32_0 = arith.constant 0 : i32
    return %arg0, %c0_i32 : i32, i32
  }
  func.func @transform_1(%arg0: i32) -> (i32, i32) {
    %c0_i32 = arith.constant 0 : i32
    %c0_i32_0 = arith.constant 0 : i32
    return %arg0, %c0_i32 : i32, i32
  }
  func.func @transform_2(%arg0: i32) -> (i32, i32) {
    %c0_i32 = arith.constant 0 : i32
    %c0_i32_0 = arith.constant 0 : i32
    %c0_i32_1 = arith.constant 0 : i32
    return %c0_i32, %c0_i32_0 : i32, i32
  }
  func.func @transform_3(%arg0: i32) -> (i32, i32) {
    %c0_i32 = arith.constant 0 : i32
    %c0_i32_0 = arith.constant 0 : i32
    %c0_i32_1 = arith.constant 0 : i32
    return %c0_i32, %c0_i32_0 : i32, i32
  }
  func.func @transform_4(%arg0: i32) -> (i32, i32) {
    %c0_i32 = arith.constant 0 : i32
    %c0_i32_0 = arith.constant 0 : i32
    return %arg0, %c0_i32 : i32, i32
  }
}

</mosaic_0001>

<bundles_post_ra>
// kernel: tpu_custom_call.1
= control target key start
LH: loop header
LB: loop body
LE: loop exit
PB: predicated region body
PF: predicated region fallthrough
CT: control target
= control target key end

     0   :  { %9 = vsyncpa [#allocation3], 0  ;;  %s2248_s0 = inlined_call_operand.hbm [shape: f32[512,128], index: 0, kind: input, shape index: {}]   ;;  %s2249_s1 = inlined_call_operand.hbm [shape: f32[512,128], index: 1, kind: input, shape index: {}]   ;;  %s2250_s2 = inlined_call_operand.hbm [shape: f32[1,128], index: 2, kind: input, shape index: {}]   ;;  %s2251_s3 = inlined_call_operand.hbm [shape: f32[1,128], index: 3, kind: input, shape index: {}]   ;;  %s2252_s4 = inlined_call_operand.hbm [shape: f32[512,128], index: 4, kind: output, shape index: {}]  }
   0x1   :  { %10 = vsyncpa [#allocation6], 0 }
   0x2   :  { %11 = vsyncpa [#allocation9], 0 }
   0x3   :  { %12 = vsyncpa [#allocation4], 0  ;;  %s1447_s15 = smov [#allocation5]   ;;  %s1448_s17 = smov [#allocation2]  }
   0x4   :  { %s30_s16 = sshll.u32 %s1447_s15, 4  ;;  %s18_s18 = sshll.u32 %s1448_s17, 4  ;;  %s31_s16 = int_to_ptr.vmem [resolvable:$true] %s30_s16  ;;  %s1479_s18 = int_to_ptr.vmem [resolvable:$true] %s18_s18 }
   0x5   :  { %s1329_s21 = scalar_lea.hbm %s2249_s1, 8192 }
   0x6   :  { %p1330_p0 = scmp.ne.s32.totalorder %s2249_s1, %s1329_s21  ;;  %p1333_p1 = scmp.lt.u32.totalorder %s1329_s21, %s2249_s1 }
   0x8   :  { %p1335_p2 = pnand %p1333_p1, %p1330_p0 }
   0xa   :  { %1338 = shalt.err (!%p1335_p2)
}
   0xb   :  { %s1339_s26 = scalar_lea.vmem %s31_s16, 8192  ;;  %p1344_p4 = scmp.lt.s32.totalorder %s31_s16, %s31_s16 }
   0xc   :  { %p1340_p3 = scmp.ne.s32.totalorder %s31_s16, %s1339_s26  ;;  %p1345_p5 = scmp.lt.s32.totalorder %s1339_s26, %s1339_s26 }
   0xe   :  { %p1346_p6 = por %p1345_p5, %p1344_p4 }
  0x10   :  { %p1347_p7 = pnand %p1346_p6, %p1340_p3 }
  0x12   :  { %1350 = shalt.err (!%p1347_p7)
}
  0x13   :  { %s1449_s27 = smov 128   ;;  %s1450_s28 = smov 8  }
  0x14   :  { %36 = dma.hbm_to_vmem [thread:$0]  %s2249_s1, 8192, %s31_s16, [#allocation6], %s1449_s27, %s1449_s27, %s1450_s28  }
  0x15   :  { %s1351_s7 = scalar_lea.hbm %s2248_s0, 8192 }
  0x16   :  { %p1352_p8 = scmp.ne.s32.totalorder %s2248_s0, %s1351_s7  ;;  %p1355_p9 = scmp.lt.u32.totalorder %s1351_s7, %s2248_s0 }
  0x18   :  { %p1357_p10 = pnand %p1355_p9, %p1352_p8 }
  0x1a   :  { %1360 = shalt.err (!%p1357_p10)
}
  0x1b   :  { %s1361_s12 = scalar_lea.vmem %s1479_s18, 8192  ;;  %p1366_p12 = scmp.lt.s32.totalorder %s1479_s18, %s1479_s18 }
  0x1c   :  { %p1362_p11 = scmp.ne.s32.totalorder %s1479_s18, %s1361_s12  ;;  %p1367_p13 = scmp.lt.s32.totalorder %s1361_s12, %s1361_s12 }
  0x1e   :  { %p1368_p0 = por %p1367_p13, %p1366_p12 }
  0x20   :  { %p1369_p1 = pnand %p1368_p0, %p1362_p11 }
  0x22   :  { %1372 = shalt.err (!%p1369_p1)
}
  0x23   :  { %24 = dma.hbm_to_vmem [thread:$0]  %s2248_s0, 8192, %s1479_s18, [#allocation3], %s1449_s27, %s1449_s27, %s1450_s28  }
  0x24   :  { %s1451_s14 = smov [#allocation7]   ;;  %s1452_s16 = smov [#allocation8]  }
  0x25   :  { %s43_s15 = sshll.u32 %s1451_s14, 4  ;;  %s53_s17 = sshll.u32 %s1452_s16, 4  ;;  %s44_s15 = int_to_ptr.vmem [resolvable:$true] %s43_s15  ;;  %s54_s17 = int_to_ptr.vmem [resolvable:$true] %s53_s17 }
  0x26   :  { %s1373_s21 = scalar_lea.hbm %s2250_s2, 16 }
  0x27   :  { %p1374_p2 = scmp.ne.s32.totalorder %s2250_s2, %s1373_s21  ;;  %p1377_p3 = scmp.lt.u32.totalorder %s1373_s21, %s2250_s2 }
  0x29   :  { %p1379_p4 = pnand %p1377_p3, %p1374_p2 }
  0x2b   :  { %1382 = shalt.err (!%p1379_p4)
}
  0x2c   :  { %s1383_s0 = scalar_lea.vmem %s44_s15, 16  ;;  %s1387_s18 = scalar_lea.vmem %s44_s15, 32 }
  0x2d   :  { %p1384_p5 = scmp.ne.s32.totalorder %s44_s15, %s1383_s0  ;;  %p1388_p6 = scmp.lt.s32.totalorder %s44_s15, %s44_s15 }
  0x2e   :  { %p1389_p7 = scmp.lt.s32.totalorder %s1387_s18, %s1383_s0 }
  0x30   :  { %p1390_p8 = por %p1389_p7, %p1388_p6 }
  0x32   :  { %p1391_p9 = pnand %p1390_p8, %p1384_p5 }
  0x34   :  { %1394 = shalt.err (!%p1391_p9)
}
  0x35   :  { %46 = dma.hbm_to_vmem [thread:$0]  %s2250_s2, 16, %s44_s15, [#allocation6]  }
  0x36   :  { %s1395_s6 = scalar_lea.hbm %s2251_s3, 16 }
  0x37   :  { %p1396_p10 = scmp.ne.s32.totalorder %s2251_s3, %s1395_s6  ;;  %p1399_p11 = scmp.lt.u32.totalorder %s1395_s6, %s2251_s3 }
  0x39   :  { %p1401_p12 = pnand %p1399_p11, %p1396_p10 }
  0x3b   :  { %1404 = shalt.err (!%p1401_p12)
}
  0x3c   :  { %s1405_s11 = scalar_lea.vmem %s54_s17, 16  ;;  %s1409_s12 = scalar_lea.vmem %s54_s17, 32 }
  0x3d   :  { %p1406_p13 = scmp.ne.s32.totalorder %s54_s17, %s1405_s11  ;;  %p1410_p0 = scmp.lt.s32.totalorder %s54_s17, %s54_s17 }
  0x3e   :  { %p1411_p1 = scmp.lt.s32.totalorder %s1409_s12, %s1405_s11 }
  0x40   :  { %p1412_p2 = por %p1411_p1, %p1410_p0 }
  0x42   :  { %p1413_p3 = pnand %p1412_p2, %p1406_p13 }
  0x44   :  { %1416 = shalt.err (!%p1413_p3)
}
  0x45   :  { %56 = dma.hbm_to_vmem [thread:$0]  %s2251_s3, 16, %s54_s17, [#allocation9]  }
  0x46   :  { %1439 = dma.done.wait [#allocation3], 8192  }
  0x47   :  { %1440 = vsyncadd [#allocation3], 4294959104 }
  0x48   :  { %1441 = dma.done.wait [#allocation6], 8208  }
  0x49   :  { %1442 = vsyncadd [#allocation6], 4294959088 }
  0x4a   :  { %1443 = dma.done.wait [#allocation9], 16  }
  0x4b   :  { %1444 = vsyncadd [#allocation9], 4294967280  ;;  %v69_v0 = vld [vmem:[#allocation2] sm:$0xff]  ;;  %v71_v2 = vld [vmem:[#allocation2 + $0x10] sm:$0xff]  ;;  %s1453_s3 = smov [#allocation10]  }
  0x4c   :  { %v133_v1 = vld [vmem:[#allocation5] sm:$0xff]  ;;  %v135_v4 = vld [vmem:[#allocation5 + $0x10] sm:$0xff]  ;;  %v70_v5 = vld [vmem:[#allocation2 + $0x8] sm:$0xff]  ;;  %s1176_s13 = sshll.u32 %s1453_s3, 4  ;;  %s1177_s13 = int_to_ptr.vmem [resolvable:$true] %s1176_s13 }
  0x4d   :  { %v1540_v3 = vadd.f32 %v133_v1, %v69_v0  ;;  %v134_v6 = vld [vmem:[#allocation5 + $0x8] sm:$0xff]  ;;  %v1542_v7 = vadd.f32 %v135_v4, %v71_v2  ;;  %v72_v8 = vld [vmem:[#allocation2 + $0x18] sm:$0xff]  ;;  %v73_v12 = vld [vmem:[#allocation2 + $0x20] sm:$0xff]  ;;  %s1417_s14 = scalar_lea.vmem %s1177_s13, 8192  ;;  %p1422_p5 = scmp.lt.s32.totalorder %s1177_s13, %s1177_s13 }
  0x4e   :  { %v136_v9 = vld [vmem:[#allocation5 + $0x18] sm:$0xff]  ;;  %v1545_v10 = vadd.f32 %v134_v6, %v70_v5  ;;  %v137_v13 = vld [vmem:[#allocation5 + $0x20] sm:$0xff]  ;;  %v74_v14 = vld [vmem:[#allocation2 + $0x28] sm:$0xff]  ;;  %p1418_p4 = scmp.ne.s32.totalorder %s1177_s13, %s1417_s14  ;;  %p1423_p6 = scmp.lt.s32.totalorder %s1417_s14, %s1417_s14 }
  0x4f   :  { %261 = vadd.xlane.f32.xlu0 %v1540_v3  ;;  %265 = vadd.xlane.f32.xlu1 %v1542_v7  ;;  %v1548_v11 = vadd.f32 %v136_v9, %v72_v8  ;;  %v138_v15 = vld [vmem:[#allocation5 + $0x28] sm:$0xff]  ;;  %v1551_v16 = vadd.f32 %v137_v13, %v73_v12  ;;  %v75_v18 = vld [vmem:[#allocation2 + $0x30] sm:$0xff]  ;;  %v76_v20 = vld [vmem:[#allocation2 + $0x38] sm:$0xff] }
  0x50   :  { %v1554_v17 = vadd.f32 %v138_v15, %v74_v14  ;;  %v139_v19 = vld [vmem:[#allocation5 + $0x30] sm:$0xff]  ;;  %v140_v21 = vld [vmem:[#allocation5 + $0x38] sm:$0xff]  ;;  %v77_v24 = vld [vmem:[#allocation2 + $0x40] sm:$0xff]  ;;  %p1424_p7 = por %p1423_p6, %p1422_p5 }
  0x51   :  { %v1557_v22 = vadd.f32 %v139_v19, %v75_v18  ;;  %v1560_v23 = vadd.f32 %v140_v21, %v76_v20  ;;  %v141_v25 = vld [vmem:[#allocation5 + $0x40] sm:$0xff]  ;;  %v78_v26 = vld [vmem:[#allocation2 + $0x48] sm:$0xff]  ;;  %v79_v30 = vld [vmem:[#allocation2 + $0x50] sm:$0xff] }
  0x52   :  { %v142_v27 = vld [vmem:[#allocation5 + $0x48] sm:$0xff]  ;;  %v1563_v28 = vadd.f32 %v141_v25, %v77_v24  ;;  %v143_v31 = vld [vmem:[#allocation5 + $0x50] sm:$0xff]  ;;  %v80_v32 = vld [vmem:[#allocation2 + $0x58] sm:$0xff]  ;;  %p1425_p8 = pnand %p1424_p7, %p1418_p4 }
  0x53   :  { %263 = vadd.xlane.f32.xlu0 %v1545_v10  ;;  %267 = vadd.xlane.f32.xlu1 %v1548_v11  ;;  %v1566_v29 = vadd.f32 %v142_v27, %v78_v26  ;;  %v144_v33 = vld [vmem:[#allocation5 + $0x58] sm:$0xff]  ;;  %v1569_v34 = vadd.f32 %v143_v31, %v79_v30  ;;  %v81_v36 = vld [vmem:[#allocation2 + $0x60] sm:$0xff]  ;;  %v82_v38 = vld [vmem:[#allocation2 + $0x68] sm:$0xff] }
  0x54   :  { %v1572_v35 = vadd.f32 %v144_v33, %v80_v32  ;;  %v145_v37 = vld [vmem:[#allocation5 + $0x60] sm:$0xff]  ;;  %v146_v39 = vld [vmem:[#allocation5 + $0x68] sm:$0xff]  ;;  %v83_v42 = vld [vmem:[#allocation2 + $0x70] sm:$0xff] }
  0x55   :  { %v1575_v40 = vadd.f32 %v145_v37, %v81_v36  ;;  %v1578_v41 = vadd.f32 %v146_v39, %v82_v38  ;;  %v147_v43 = vld [vmem:[#allocation5 + $0x70] sm:$0xff]  ;;  %v84_v44 = vld [vmem:[#allocation2 + $0x78] sm:$0xff]  ;;  %v85_v48 = vld [vmem:[#allocation2 + $0x80] sm:$0xff] }
  0x56   :  { %v148_v45 = vld [vmem:[#allocation5 + $0x78] sm:$0xff]  ;;  %v1581_v46 = vadd.f32 %v147_v43, %v83_v42  ;;  %v149_v49 = vld [vmem:[#allocation5 + $0x80] sm:$0xff]  ;;  %v86_v50 = vld [vmem:[#allocation2 + $0x88] sm:$0xff] }
  0x57   :  { %269 = vadd.xlane.f32.xlu0 %v1551_v16  ;;  %271 = vadd.xlane.f32.xlu1 %v1554_v17  ;;  %v1584_v47 = vadd.f32 %v148_v45, %v84_v44  ;;  %v150_v51 = vld [vmem:[#allocation5 + $0x88] sm:$0xff]  ;;  %v1587_v52 = vadd.f32 %v149_v49, %v85_v48  ;;  %v87_v54 = vld [vmem:[#allocation2 + $0x90] sm:$0xff]  ;;  %v88_v56 = vld [vmem:[#allocation2 + $0x98] sm:$0xff] }
  0x58   :  { %v1590_v53 = vadd.f32 %v150_v51, %v86_v50  ;;  %v151_v55 = vld [vmem:[#allocation5 + $0x90] sm:$0xff]  ;;  %v152_v57 = vld [vmem:[#allocation5 + $0x98] sm:$0xff]  ;;  %v89_v60 = vld [vmem:[#allocation2 + $0xa0] sm:$0xff] }
  0x59   :  { %v1593_v58 = vadd.f32 %v151_v55, %v87_v54  ;;  %v1596_v59 = vadd.f32 %v152_v57, %v88_v56  ;;  %v153_v61 = vld [vmem:[#allocation5 + $0xa0] sm:$0xff]  ;;  %v90_v62 = vld [vmem:[#allocation2 + $0xa8] sm:$0xff]  ;;  %v91_v2 = vld [vmem:[#allocation2 + $0xb0] sm:$0xff] }
  0x5a   :  { %v154_v63 = vld [vmem:[#allocation5 + $0xa8] sm:$0xff]  ;;  %v1599_v0 = vadd.f32 %v153_v61, %v89_v60  ;;  %v155_v4 = vld [vmem:[#allocation5 + $0xb0] sm:$0xff]  ;;  %v92_v5 = vld [vmem:[#allocation2 + $0xb8] sm:$0xff] }
  0x5b   :  { %273 = vadd.xlane.f32.xlu0 %v1557_v22  ;;  %275 = vadd.xlane.f32.xlu1 %v1560_v23  ;;  %v1602_v1 = vadd.f32 %v154_v63, %v90_v62  ;;  %v156_v6 = vld [vmem:[#allocation5 + $0xb8] sm:$0xff]  ;;  %v1605_v8 = vadd.f32 %v155_v4, %v91_v2  ;;  %v93_v12 = vld [vmem:[#allocation2 + $0xc0] sm:$0xff]  ;;  %v94_v14 = vld [vmem:[#allocation2 + $0xc8] sm:$0xff] }
  0x5c   :  { %v1608_v9 = vadd.f32 %v156_v6, %v92_v5  ;;  %v157_v13 = vld [vmem:[#allocation5 + $0xc0] sm:$0xff]  ;;  %v158_v15 = vld [vmem:[#allocation5 + $0xc8] sm:$0xff]  ;;  %v95_v20 = vld [vmem:[#allocation2 + $0xd0] sm:$0xff] }
  0x5d   :  { %v1611_v18 = vadd.f32 %v157_v13, %v93_v12  ;;  %v1614_v19 = vadd.f32 %v158_v15, %v94_v14  ;;  %v159_v21 = vld [vmem:[#allocation5 + $0xd0] sm:$0xff]  ;;  %v96_v24 = vld [vmem:[#allocation2 + $0xd8] sm:$0xff]  ;;  %v97_v30 = vld [vmem:[#allocation2 + $0xe0] sm:$0xff] }
  0x5e   :  { %v160_v25 = vld [vmem:[#allocation5 + $0xd8] sm:$0xff]  ;;  %v1617_v26 = vadd.f32 %v159_v21, %v95_v20  ;;  %v161_v31 = vld [vmem:[#allocation5 + $0xe0] sm:$0xff]  ;;  %v98_v32 = vld [vmem:[#allocation2 + $0xe8] sm:$0xff] }
  0x5f   :  { %277 = vadd.xlane.f32.xlu0 %v1563_v28  ;;  %279 = vadd.xlane.f32.xlu1 %v1566_v29  ;;  %v1620_v27 = vadd.f32 %v160_v25, %v96_v24  ;;  %v162_v33 = vld [vmem:[#allocation5 + $0xe8] sm:$0xff]  ;;  %v1623_v36 = vadd.f32 %v161_v31, %v97_v30  ;;  %v99_v38 = vld [vmem:[#allocation2 + $0xf0] sm:$0xff]  ;;  %v100_v42 = vld [vmem:[#allocation2 + $0xf8] sm:$0xff] }
  0x60   :  { %v1626_v37 = vadd.f32 %v162_v33, %v98_v32  ;;  %v163_v39 = vld [vmem:[#allocation5 + $0xf0] sm:$0xff]  ;;  %v164_v43 = vld [vmem:[#allocation5 + $0xf8] sm:$0xff]  ;;  %v101_v48 = vld [vmem:[#allocation2 + $0x100] sm:$0xff] }
  0x61   :  { %v1629_v44 = vadd.f32 %v163_v39, %v99_v38  ;;  %v1632_v45 = vadd.f32 %v164_v43, %v100_v42  ;;  %v165_v49 = vld [vmem:[#allocation5 + $0x100] sm:$0xff]  ;;  %v102_v50 = vld [vmem:[#allocation2 + $0x108] sm:$0xff]  ;;  %v103_v56 = vld [vmem:[#allocation2 + $0x110] sm:$0xff] }
  0x62   :  { %v166_v51 = vld [vmem:[#allocation5 + $0x108] sm:$0xff]  ;;  %v1635_v54 = vadd.f32 %v165_v49, %v101_v48  ;;  %v167_v57 = vld [vmem:[#allocation5 + $0x110] sm:$0xff]  ;;  %v104_v60 = vld [vmem:[#allocation2 + $0x118] sm:$0xff] }
  0x63   :  { %281 = vadd.xlane.f32.xlu0 %v1569_v34  ;;  %283 = vadd.xlane.f32.xlu1 %v1572_v35  ;;  %v1638_v55 = vadd.f32 %v166_v51, %v102_v50  ;;  %v168_v61 = vld [vmem:[#allocation5 + $0x118] sm:$0xff]  ;;  %v1641_v62 = vadd.f32 %v167_v57, %v103_v56  ;;  %v105_v2 = vld [vmem:[#allocation2 + $0x120] sm:$0xff]  ;;  %v106_v5 = vld [vmem:[#allocation2 + $0x128] sm:$0xff] }
  0x64   :  { %v1644_v63 = vadd.f32 %v168_v61, %v104_v60  ;;  %v169_v4 = vld [vmem:[#allocation5 + $0x120] sm:$0xff]  ;;  %v170_v6 = vld [vmem:[#allocation5 + $0x128] sm:$0xff]  ;;  %v107_v14 = vld [vmem:[#allocation2 + $0x130] sm:$0xff] }
  0x65   :  { %v1647_v12 = vadd.f32 %v169_v4, %v105_v2  ;;  %v1650_v13 = vadd.f32 %v170_v6, %v106_v5  ;;  %v171_v15 = vld [vmem:[#allocation5 + $0x130] sm:$0xff]  ;;  %v108_v20 = vld [vmem:[#allocation2 + $0x138] sm:$0xff]  ;;  %v109_v30 = vld [vmem:[#allocation2 + $0x140] sm:$0xff] }
  0x66   :  { %v172_v21 = vld [vmem:[#allocation5 + $0x138] sm:$0xff]  ;;  %v1653_v24 = vadd.f32 %v171_v15, %v107_v14  ;;  %v173_v31 = vld [vmem:[#allocation5 + $0x140] sm:$0xff]  ;;  %v110_v32 = vld [vmem:[#allocation2 + $0x148] sm:$0xff] }
  0x67   :  { %285 = vadd.xlane.f32.xlu0 %v1575_v40  ;;  %287 = vadd.xlane.f32.xlu1 %v1578_v41  ;;  %v1656_v25 = vadd.f32 %v172_v21, %v108_v20  ;;  %v174_v33 = vld [vmem:[#allocation5 + $0x148] sm:$0xff]  ;;  %v1659_v38 = vadd.f32 %v173_v31, %v109_v30  ;;  %v111_v42 = vld [vmem:[#allocation2 + $0x150] sm:$0xff]  ;;  %v112_v48 = vld [vmem:[#allocation2 + $0x158] sm:$0xff] }
  0x68   :  { %v1662_v39 = vadd.f32 %v174_v33, %v110_v32  ;;  %v175_v43 = vld [vmem:[#allocation5 + $0x150] sm:$0xff]  ;;  %v176_v49 = vld [vmem:[#allocation5 + $0x158] sm:$0xff]  ;;  %v113_v56 = vld [vmem:[#allocation2 + $0x160] sm:$0xff] }
  0x69   :  { %v1665_v50 = vadd.f32 %v175_v43, %v111_v42  ;;  %v1668_v51 = vadd.f32 %v176_v49, %v112_v48  ;;  %v177_v57 = vld [vmem:[#allocation5 + $0x160] sm:$0xff]  ;;  %v114_v60 = vld [vmem:[#allocation2 + $0x168] sm:$0xff]  ;;  %v115_v5 = vld [vmem:[#allocation2 + $0x170] sm:$0xff] }
  0x6a   :  { %v178_v61 = vld [vmem:[#allocation5 + $0x168] sm:$0xff]  ;;  %v1671_v2 = vadd.f32 %v177_v57, %v113_v56  ;;  %v179_v6 = vld [vmem:[#allocation5 + $0x170] sm:$0xff]  ;;  %v116_v14 = vld [vmem:[#allocation2 + $0x178] sm:$0xff] }
  0x6b   :  { %289 = vadd.xlane.f32.xlu0 %v1581_v46  ;;  %291 = vadd.xlane.f32.xlu1 %v1584_v47  ;;  %v1674_v4 = vadd.f32 %v178_v61, %v114_v60  ;;  %v180_v15 = vld [vmem:[#allocation5 + $0x178] sm:$0xff]  ;;  %v1677_v20 = vadd.f32 %v179_v6, %v115_v5  ;;  %v117_v30 = vld [vmem:[#allocation2 + $0x180] sm:$0xff]  ;;  %v118_v32 = vld [vmem:[#allocation2 + $0x188] sm:$0xff] }
  0x6c   :  { %v1680_v21 = vadd.f32 %v180_v15, %v116_v14  ;;  %v181_v31 = vld [vmem:[#allocation5 + $0x180] sm:$0xff]  ;;  %v182_v33 = vld [vmem:[#allocation5 + $0x188] sm:$0xff]  ;;  %v119_v48 = vld [vmem:[#allocation2 + $0x190] sm:$0xff] }
  0x6d   :  { %v1683_v42 = vadd.f32 %v181_v31, %v117_v30  ;;  %v1686_v43 = vadd.f32 %v182_v33, %v118_v32  ;;  %v183_v49 = vld [vmem:[#allocation5 + $0x190] sm:$0xff]  ;;  %v120_v56 = vld [vmem:[#allocation2 + $0x198] sm:$0xff]  ;;  %v121_v5 = vld [vmem:[#allocation2 + $0x1a0] sm:$0xff] }
  0x6e   :  { %v184_v57 = vld [vmem:[#allocation5 + $0x198] sm:$0xff]  ;;  %v1689_v60 = vadd.f32 %v183_v49, %v119_v48  ;;  %v185_v6 = vld [vmem:[#allocation5 + $0x1a0] sm:$0xff]  ;;  %v122_v14 = vld [vmem:[#allocation2 + $0x1a8] sm:$0xff] }
  0x6f   :  { %293 = vadd.xlane.f32.xlu0 %v1587_v52  ;;  %295 = vadd.xlane.f32.xlu1 %v1590_v53  ;;  %2286 = vst [vmem:[#allocation15_spill] sm:$0xff] %v1686_v43  ;;  %v1692_v61 = vadd.f32 %v184_v57, %v120_v56  ;;  %v186_v15 = vld [vmem:[#allocation5 + $0x1a8] sm:$0xff]  ;;  %v1695_v30 = vadd.f32 %v185_v6, %v121_v5  ;;  %v123_v32 = vld [vmem:[#allocation2 + $0x1b0] sm:$0xff]  ;;  %v124_v48 = vld [vmem:[#allocation2 + $0x1b8] sm:$0xff] }
  0x70   :  { %2287 = vst [vmem:[#allocation16_spill] sm:$0xff] %v1689_v60  ;;  %v1698_v31 = vadd.f32 %v186_v15, %v122_v14  ;;  %v187_v33 = vld [vmem:[#allocation5 + $0x1b0] sm:$0xff]  ;;  %v188_v49 = vld [vmem:[#allocation5 + $0x1b8] sm:$0xff]  ;;  %v126_v5 = vld [vmem:[#allocation2 + $0x1c8] sm:$0xff] }
  0x71   :  { %2288 = vst [vmem:[#allocation17_spill] sm:$0xff] %v1692_v61  ;;  %2289 = vst [vmem:[#allocation18_spill] sm:$0xff] %v1695_v30  ;;  %v1701_v56 = vadd.f32 %v187_v33, %v123_v32  ;;  %v1704_v57 = vadd.f32 %v188_v49, %v124_v48  ;;  %v190_v6 = vld [vmem:[#allocation5 + $0x1c8] sm:$0xff]  ;;  %v128_v32 = vld [vmem:[#allocation2 + $0x1d8] sm:$0xff] }
  0x72   :  { %2290 = vst [vmem:[#allocation19_spill] sm:$0xff] %v1698_v31  ;;  %v1710_v15 = vadd.f32 %v190_v6, %v126_v5  ;;  %v192_v33 = vld [vmem:[#allocation5 + $0x1d8] sm:$0xff] }
  0x73   :  { %297 = vadd.xlane.f32.xlu0 %v1593_v58  ;;  %299 = vadd.xlane.f32.xlu1 %v1596_v59  ;;  %2291 = vst [vmem:[#allocation20_spill] sm:$0xff] %v1701_v56  ;;  %2292 = vst [vmem:[#allocation21_spill] sm:$0xff] %v1704_v57  ;;  %v1716_v49 = vadd.f32 %v192_v33, %v128_v32 }
  0x75   :  { %2295 = vst [vmem:[#allocation24_spill] sm:$0xff] %v1716_v49 }
  0x77   :  { %301 = vadd.xlane.f32.xlu0 %v1599_v0  ;;  %303 = vadd.xlane.f32.xlu1 %v1602_v1 }
  0x7b   :  { %305 = vadd.xlane.f32.xlu0 %v1605_v8  ;;  %307 = vadd.xlane.f32.xlu1 %v1608_v9 }
  0x7f   :  { %309 = vadd.xlane.f32.xlu0 %v1611_v18  ;;  %311 = vadd.xlane.f32.xlu1 %v1614_v19 }
  0x83   :  { %313 = vadd.xlane.f32.xlu0 %v1617_v26  ;;  %315 = vadd.xlane.f32.xlu1 %v1620_v27 }
  0x87   :  { %317 = vadd.xlane.f32.xlu0 %v1623_v36  ;;  %319 = vadd.xlane.f32.xlu1 %v1626_v37 }
  0x8b   :  { %321 = vadd.xlane.f32.xlu0 %v1629_v44  ;;  %323 = vadd.xlane.f32.xlu1 %v1632_v45 }
  0x8f   :  { %325 = vadd.xlane.f32.xlu0 %v1635_v54  ;;  %327 = vadd.xlane.f32.xlu1 %v1638_v55 }
  0x93   :  { %329 = vadd.xlane.f32.xlu0 %v1641_v62  ;;  %331 = vadd.xlane.f32.xlu1 %v1644_v63 }
  0x97   :  { %333 = vadd.xlane.f32.xlu0 %v1647_v12  ;;  %335 = vadd.xlane.f32.xlu1 %v1650_v13 }
  0x9b   :  { %337 = vadd.xlane.f32.xlu0 %v1653_v24  ;;  %339 = vadd.xlane.f32.xlu1 %v1656_v25 }
  0x9f   :  { %341 = vadd.xlane.f32.xlu0 %v1659_v38  ;;  %343 = vadd.xlane.f32.xlu1 %v1662_v39 }
  0xa3   :  { %345 = vadd.xlane.f32.xlu0 %v1665_v50  ;;  %347 = vadd.xlane.f32.xlu1 %v1668_v51 }
  0xa7   :  { %349 = vadd.xlane.f32.xlu0 %v1671_v2  ;;  %351 = vadd.xlane.f32.xlu1 %v1674_v4 }
  0xab   :  { %353 = vadd.xlane.f32.xlu0 %v1677_v20  ;;  %355 = vadd.xlane.f32.xlu1 %v1680_v21 }
  0xaf   :  { %357 = vadd.xlane.f32.xlu0 %v1683_v42  ;;  %359 = vadd.xlane.f32.xlu1 %v1686_v43  ;;  %v125_v43 = vld [vmem:[#allocation2 + $0x1c0] sm:$0xff] }
  0xb3   :  { %361 = vadd.xlane.f32.xlu0 %v1689_v60  ;;  %363 = vadd.xlane.f32.xlu1 %v1692_v61  ;;  %v189_v60 = vld [vmem:[#allocation5 + $0x1c0] sm:$0xff]  ;;  %v127_v61 = vld [vmem:[#allocation2 + $0x1d0] sm:$0xff] }
  0xb4   :  { %v1707_v14 = vadd.f32 %v189_v60, %v125_v43  ;;  %v130_v43 = vld [vmem:[#allocation2 + $0x1e8] sm:$0xff] }
  0xb5   :  { %v194_v60 = vld [vmem:[#allocation5 + $0x1e8] sm:$0xff] }
  0xb6   :  { %2293 = vst [vmem:[#allocation22_spill] sm:$0xff] %v1707_v14  ;;  %v1722_v6 = vadd.f32 %v194_v60, %v130_v43 }
  0xb7   :  { %365 = vadd.xlane.f32.xlu0 %v1695_v30  ;;  %367 = vadd.xlane.f32.xlu1 %v1698_v31  ;;  %v191_v30 = vld [vmem:[#allocation5 + $0x1d0] sm:$0xff]  ;;  %v129_v31 = vld [vmem:[#allocation2 + $0x1e0] sm:$0xff] }
  0xb8   :  { %v1713_v48 = vadd.f32 %v191_v30, %v127_v61  ;;  %v132_v61 = vld [vmem:[#allocation2 + $0x1f8] sm:$0xff] }
  0xb9   :  { %v196_v30 = vld [vmem:[#allocation5 + $0x1f8] sm:$0xff] }
  0xba   :  { %2294 = vst [vmem:[#allocation23_spill] sm:$0xff] %v1713_v48  ;;  %v1728_v33 = vadd.f32 %v196_v30, %v132_v61 }
  0xbb   :  { %369 = vadd.xlane.f32.xlu0 %v1701_v56  ;;  %371 = vadd.xlane.f32.xlu1 %v1704_v57  ;;  %v193_v56 = vld [vmem:[#allocation5 + $0x1e0] sm:$0xff]  ;;  %v131_v57 = vld [vmem:[#allocation2 + $0x1f0] sm:$0xff] }
  0xbc   :  { %v1719_v5 = vadd.f32 %v193_v56, %v129_v31  ;;  %2297 = vst [vmem:[#allocation26_spill] sm:$0xff] %v1728_v33 }
  0xbe   :  { %2296 = vst [vmem:[#allocation25_spill] sm:$0xff] %v1719_v5 }
  0xbf   :  { %373 = vadd.xlane.f32.xlu0 %v1707_v14  ;;  %375 = vadd.xlane.f32.xlu1 %v1710_v15  ;;  %v195_v14 = vld [vmem:[#allocation5 + $0x1f0] sm:$0xff] }
  0xc0   :  { %v1725_v32 = vadd.f32 %v195_v14, %v131_v57 }
  0xc3   :  { %377 = vadd.xlane.f32.xlu0 %v1713_v48  ;;  %379 = vadd.xlane.f32.xlu1 %v1716_v49 }
  0xc7   :  { %381 = vadd.xlane.f32.xlu0 %v1719_v5  ;;  %383 = vadd.xlane.f32.xlu1 %v1722_v6 }
  0xcb   :  { %385 = vadd.xlane.f32.xlu0 %v1725_v32  ;;  %387 = vadd.xlane.f32.xlu1 %v1728_v33 }
  0xdc   :  { %v262_v31 = vpop.xlane.xlu0 %261  ;;  %v266_v43 = vpop.xlane.xlu1 %265 }
  0xdd   :  { %v389_v56 = vmul.f32 0.0078125, %v262_v31  ;;  %v391_v60 = vmul.f32 0.0078125, %v266_v43 }
  0xdf   :  { %v1733_v49 = vsub.f32 %v1540_v3, %v389_v56  ;;  %v1736_v5 = vsub.f32 %v1542_v7, %v391_v60 }
  0xe0   :  { %v264_v48 = vpop.xlane.xlu0 %263  ;;  %v268_v61 = vpop.xlane.xlu1 %267 }
  0xe1   :  { %2298 = vst [vmem:[#allocation27_spill] sm:$0xff] %v1736_v5  ;;  %v390_v57 = vmul.f32 0.0078125, %v264_v48  ;;  %v517_v14 = vmul.f32 %v1733_v49, %v1733_v49  ;;  %v392_v30 = vmul.f32 0.0078125, %v268_v61  ;;  %v519_v33 = vmul.f32 %v1736_v5, %v1736_v5 }
  0xe3   :  { %581 = vadd.xlane.f32.xlu0 %v517_v14  ;;  %v1743_v31 = vsub.f32 %v1545_v10, %v390_v57  ;;  %v1746_v3 = vsub.f32 %v1548_v11, %v392_v30 }
  0xe4   :  { %v270_v43 = vpop.xlane.xlu0 %269  ;;  %v272_v48 = vpop.xlane.xlu1 %271 }
  0xe5   :  { %v393_v56 = vmul.f32 0.0078125, %v270_v43  ;;  %v518_v7 = vmul.f32 %v1743_v31, %v1743_v31  ;;  %v394_v60 = vmul.f32 0.0078125, %v272_v48  ;;  %v520_v14 = vmul.f32 %v1746_v3, %v1746_v3 }
  0xe7   :  { %585 = vadd.xlane.f32.xlu0 %v519_v33  ;;  %583 = vadd.xlane.f32.xlu1 %v518_v7  ;;  %v1753_v61 = vsub.f32 %v1551_v16, %v393_v56  ;;  %v1756_v57 = vsub.f32 %v1554_v17, %v394_v60 }
  0xe8   :  { %v274_v10 = vpop.xlane.xlu0 %273  ;;  %v276_v43 = vpop.xlane.xlu1 %275 }
  0xe9   :  { %v395_v11 = vmul.f32 0.0078125, %v274_v10  ;;  %v521_v30 = vmul.f32 %v1753_v61, %v1753_v61  ;;  %v396_v5 = vmul.f32 0.0078125, %v276_v43  ;;  %v522_v33 = vmul.f32 %v1756_v57, %v1756_v57 }
  0xeb   :  { %587 = vadd.xlane.f32.xlu1 %v520_v14  ;;  %589 = vadd.xlane.f32.xlu0 %v521_v30  ;;  %v1763_v7 = vsub.f32 %v1557_v22, %v395_v11  ;;  %v1766_v56 = vsub.f32 %v1560_v23, %v396_v5 }
  0xec   :  { %v278_v16 = vpop.xlane.xlu0 %277  ;;  %v280_v60 = vpop.xlane.xlu1 %279 }
  0xed   :  { %v397_v17 = vmul.f32 0.0078125, %v278_v16  ;;  %v523_v48 = vmul.f32 %v1763_v7, %v1763_v7  ;;  %v398_v10 = vmul.f32 0.0078125, %v280_v60  ;;  %v524_v14 = vmul.f32 %v1766_v56, %v1766_v56 }
  0xef   :  { %591 = vadd.xlane.f32.xlu1 %v522_v33  ;;  %593 = vadd.xlane.f32.xlu0 %v523_v48  ;;  %v1773_v30 = vsub.f32 %v1563_v28, %v397_v17  ;;  %v1776_v11 = vsub.f32 %v1566_v29, %v398_v10 }
  0xf0   :  { %v282_v22 = vpop.xlane.xlu0 %281  ;;  %v284_v43 = vpop.xlane.xlu1 %283 }
  0xf1   :  { %v399_v23 = vmul.f32 0.0078125, %v282_v22  ;;  %v525_v5 = vmul.f32 %v1773_v30, %v1773_v30  ;;  %v400_v16 = vmul.f32 0.0078125, %v284_v43  ;;  %v526_v33 = vmul.f32 %v1776_v11, %v1776_v11 }
  0xf3   :  { %595 = vadd.xlane.f32.xlu1 %v524_v14  ;;  %597 = vadd.xlane.f32.xlu0 %v525_v5  ;;  %v1783_v48 = vsub.f32 %v1569_v34, %v399_v23  ;;  %v1786_v17 = vsub.f32 %v1572_v35, %v400_v16 }
  0xf4   :  { %v286_v28 = vpop.xlane.xlu0 %285  ;;  %v288_v10 = vpop.xlane.xlu1 %287 }
  0xf5   :  { %v401_v29 = vmul.f32 0.0078125, %v286_v28  ;;  %v527_v60 = vmul.f32 %v1783_v48, %v1783_v48  ;;  %v402_v22 = vmul.f32 0.0078125, %v288_v10  ;;  %v528_v14 = vmul.f32 %v1786_v17, %v1786_v17 }
  0xf7   :  { %599 = vadd.xlane.f32.xlu1 %v526_v33  ;;  %601 = vadd.xlane.f32.xlu0 %v527_v60  ;;  %v1793_v5 = vsub.f32 %v1575_v40, %v401_v29  ;;  %v1796_v23 = vsub.f32 %v1578_v41, %v402_v22 }
  0xf8   :  { %v290_v34 = vpop.xlane.xlu0 %289  ;;  %v292_v16 = vpop.xlane.xlu1 %291 }
  0xf9   :  { %v403_v35 = vmul.f32 0.0078125, %v290_v34  ;;  %v529_v43 = vmul.f32 %v1793_v5, %v1793_v5  ;;  %v404_v28 = vmul.f32 0.0078125, %v292_v16  ;;  %v530_v33 = vmul.f32 %v1796_v23, %v1796_v23 }
  0xfb   :  { %603 = vadd.xlane.f32.xlu1 %v528_v14  ;;  %605 = vadd.xlane.f32.xlu0 %v529_v43  ;;  %v1803_v60 = vsub.f32 %v1581_v46, %v403_v35  ;;  %v1806_v29 = vsub.f32 %v1584_v47, %v404_v28 }
  0xfc   :  { %v294_v40 = vpop.xlane.xlu0 %293  ;;  %v296_v22 = vpop.xlane.xlu1 %295 }
  0xfd   :  { %v405_v41 = vmul.f32 0.0078125, %v294_v40  ;;  %v531_v10 = vmul.f32 %v1803_v60, %v1803_v60  ;;  %v406_v34 = vmul.f32 0.0078125, %v296_v22  ;;  %v532_v14 = vmul.f32 %v1806_v29, %v1806_v29 }
  0xff   :  { %607 = vadd.xlane.f32.xlu1 %v530_v33  ;;  %609 = vadd.xlane.f32.xlu0 %v531_v10  ;;  %v1813_v43 = vsub.f32 %v1587_v52, %v405_v41  ;;  %v1816_v35 = vsub.f32 %v1590_v53, %v406_v34 }
 0x100   :  { %v298_v46 = vpop.xlane.xlu0 %297  ;;  %v300_v28 = vpop.xlane.xlu1 %299 }
 0x101   :  { %v407_v47 = vmul.f32 0.0078125, %v298_v46  ;;  %v533_v16 = vmul.f32 %v1813_v43, %v1813_v43  ;;  %v408_v40 = vmul.f32 0.0078125, %v300_v28  ;;  %v534_v33 = vmul.f32 %v1816_v35, %v1816_v35 }
 0x103   :  { %611 = vadd.xlane.f32.xlu1 %v532_v14  ;;  %613 = vadd.xlane.f32.xlu0 %v533_v16  ;;  %v1823_v10 = vsub.f32 %v1593_v58, %v407_v47  ;;  %v1826_v41 = vsub.f32 %v1596_v59, %v408_v40 }
 0x104   :  { %v302_v52 = vpop.xlane.xlu0 %301  ;;  %v304_v34 = vpop.xlane.xlu1 %303 }
 0x105   :  { %v409_v53 = vmul.f32 0.0078125, %v302_v52  ;;  %v535_v22 = vmul.f32 %v1823_v10, %v1823_v10  ;;  %v410_v46 = vmul.f32 0.0078125, %v304_v34  ;;  %v536_v14 = vmul.f32 %v1826_v41, %v1826_v41 }
 0x107   :  { %615 = vadd.xlane.f32.xlu1 %v534_v33  ;;  %617 = vadd.xlane.f32.xlu0 %v535_v22  ;;  %v1833_v16 = vsub.f32 %v1599_v0, %v409_v53  ;;  %v1836_v47 = vsub.f32 %v1602_v1, %v410_v46 }
 0x108   :  { %v306_v58 = vpop.xlane.xlu0 %305  ;;  %v308_v40 = vpop.xlane.xlu1 %307 }
 0x109   :  { %v411_v59 = vmul.f32 0.0078125, %v306_v58  ;;  %v537_v28 = vmul.f32 %v1833_v16, %v1833_v16  ;;  %v412_v52 = vmul.f32 0.0078125, %v308_v40  ;;  %v538_v33 = vmul.f32 %v1836_v47, %v1836_v47 }
 0x10b   :  { %619 = vadd.xlane.f32.xlu1 %v536_v14  ;;  %621 = vadd.xlane.f32.xlu0 %v537_v28  ;;  %v1843_v22 = vsub.f32 %v1605_v8, %v411_v59  ;;  %v1846_v53 = vsub.f32 %v1608_v9, %v412_v52 }
 0x10c   :  { %v310_v0 = vpop.xlane.xlu0 %309  ;;  %v312_v46 = vpop.xlane.xlu1 %311 }
 0x10d   :  { %v413_v1 = vmul.f32 0.0078125, %v310_v0  ;;  %v539_v34 = vmul.f32 %v1843_v22, %v1843_v22  ;;  %v414_v58 = vmul.f32 0.0078125, %v312_v46  ;;  %v540_v14 = vmul.f32 %v1846_v53, %v1846_v53 }
 0x10f   :  { %623 = vadd.xlane.f32.xlu1 %v538_v33  ;;  %625 = vadd.xlane.f32.xlu0 %v539_v34  ;;  %v1853_v28 = vsub.f32 %v1611_v18, %v413_v1  ;;  %v1856_v59 = vsub.f32 %v1614_v19, %v414_v58 }
 0x110   :  { %v314_v8 = vpop.xlane.xlu0 %313  ;;  %v316_v52 = vpop.xlane.xlu1 %315 }
 0x111   :  { %v415_v9 = vmul.f32 0.0078125, %v314_v8  ;;  %v541_v40 = vmul.f32 %v1853_v28, %v1853_v28  ;;  %v416_v0 = vmul.f32 0.0078125, %v316_v52  ;;  %v542_v33 = vmul.f32 %v1856_v59, %v1856_v59 }
 0x113   :  { %627 = vadd.xlane.f32.xlu1 %v540_v14  ;;  %629 = vadd.xlane.f32.xlu0 %v541_v40  ;;  %v1863_v34 = vsub.f32 %v1617_v26, %v415_v9  ;;  %v1866_v1 = vsub.f32 %v1620_v27, %v416_v0 }
 0x114   :  { %v318_v18 = vpop.xlane.xlu0 %317  ;;  %v320_v58 = vpop.xlane.xlu1 %319 }
 0x115   :  { %v417_v19 = vmul.f32 0.0078125, %v318_v18  ;;  %v543_v46 = vmul.f32 %v1863_v34, %v1863_v34  ;;  %v418_v8 = vmul.f32 0.0078125, %v320_v58  ;;  %v544_v14 = vmul.f32 %v1866_v1, %v1866_v1 }
 0x117   :  { %631 = vadd.xlane.f32.xlu1 %v542_v33  ;;  %633 = vadd.xlane.f32.xlu0 %v543_v46  ;;  %v1873_v40 = vsub.f32 %v1623_v36, %v417_v19  ;;  %v1876_v9 = vsub.f32 %v1626_v37, %v418_v8 }
 0x118   :  { %v322_v26 = vpop.xlane.xlu0 %321  ;;  %v324_v0 = vpop.xlane.xlu1 %323 }
 0x119   :  { %v419_v27 = vmul.f32 0.0078125, %v322_v26  ;;  %v545_v52 = vmul.f32 %v1873_v40, %v1873_v40  ;;  %v420_v18 = vmul.f32 0.0078125, %v324_v0  ;;  %v546_v33 = vmul.f32 %v1876_v9, %v1876_v9 }
 0x11b   :  { %v1881_v58 = vsub.f32 %v1629_v44, %v419_v27  ;;  %635 = vadd.xlane.f32.xlu1 %v544_v14  ;;  %637 = vadd.xlane.f32.xlu0 %v545_v52  ;;  %v1886_v36 = vsub.f32 %v1632_v45, %v420_v18 }
 0x11c   :  { %v326_v19 = vpop.xlane.xlu0 %325  ;;  %v328_v8 = vpop.xlane.xlu1 %327 }
 0x11d   :  { %v421_v37 = vmul.f32 0.0078125, %v326_v19  ;;  %v547_v46 = vmul.f32 %v1881_v58, %v1881_v58  ;;  %v422_v26 = vmul.f32 0.0078125, %v328_v8  ;;  %v548_v44 = vmul.f32 %v1886_v36, %v1886_v36 }
 0x11f   :  { %v1891_v0 = vsub.f32 %v1635_v54, %v421_v37  ;;  %639 = vadd.xlane.f32.xlu1 %v546_v33  ;;  %641 = vadd.xlane.f32.xlu0 %v547_v46  ;;  %v1896_v14 = vsub.f32 %v1638_v55, %v422_v26 }
 0x120   :  { %v330_v45 = vpop.xlane.xlu0 %329  ;;  %v332_v18 = vpop.xlane.xlu1 %331 }
 0x121   :  { %v423_v27 = vmul.f32 0.0078125, %v330_v45  ;;  %v549_v52 = vmul.f32 %v1891_v0, %v1891_v0  ;;  %v424_v19 = vmul.f32 0.0078125, %v332_v18  ;;  %v550_v54 = vmul.f32 %v1896_v14, %v1896_v14 }
 0x123   :  { %v1901_v8 = vsub.f32 %v1641_v62, %v423_v27  ;;  %643 = vadd.xlane.f32.xlu1 %v548_v44  ;;  %645 = vadd.xlane.f32.xlu0 %v549_v52  ;;  %v1906_v33 = vsub.f32 %v1644_v63, %v424_v19 }
 0x124   :  { %v334_v55 = vpop.xlane.xlu0 %333  ;;  %v336_v26 = vpop.xlane.xlu1 %335 }
 0x125   :  { %v425_v37 = vmul.f32 0.0078125, %v334_v55  ;;  %v551_v46 = vmul.f32 %v1901_v8, %v1901_v8  ;;  %v426_v45 = vmul.f32 0.0078125, %v336_v26  ;;  %v552_v62 = vmul.f32 %v1906_v33, %v1906_v33 }
 0x127   :  { %v1911_v18 = vsub.f32 %v1647_v12, %v425_v37  ;;  %647 = vadd.xlane.f32.xlu1 %v550_v54  ;;  %649 = vadd.xlane.f32.xlu0 %v551_v46  ;;  %v1916_v44 = vsub.f32 %v1650_v13, %v426_v45 }
 0x128   :  { %v338_v63 = vpop.xlane.xlu0 %337  ;;  %v340_v19 = vpop.xlane.xlu1 %339 }
 0x129   :  { %v427_v27 = vmul.f32 0.0078125, %v338_v63  ;;  %v553_v52 = vmul.f32 %v1911_v18, %v1911_v18  ;;  %v428_v55 = vmul.f32 0.0078125, %v340_v19  ;;  %v554_v12 = vmul.f32 %v1916_v44, %v1916_v44 }
 0x12b   :  { %v1921_v26 = vsub.f32 %v1653_v24, %v427_v27  ;;  %651 = vadd.xlane.f32.xlu1 %v552_v62  ;;  %653 = vadd.xlane.f32.xlu0 %v553_v52  ;;  %v1926_v54 = vsub.f32 %v1656_v25, %v428_v55 }
 0x12c   :  { %v342_v13 = vpop.xlane.xlu0 %341  ;;  %v344_v45 = vpop.xlane.xlu1 %343 }
 0x12d   :  { %v429_v37 = vmul.f32 0.0078125, %v342_v13  ;;  %v555_v46 = vmul.f32 %v1921_v26, %v1921_v26  ;;  %v430_v63 = vmul.f32 0.0078125, %v344_v45  ;;  %v556_v24 = vmul.f32 %v1926_v54, %v1926_v54 }
 0x12f   :  { %v1931_v19 = vsub.f32 %v1659_v38, %v429_v37  ;;  %655 = vadd.xlane.f32.xlu1 %v554_v12  ;;  %657 = vadd.xlane.f32.xlu0 %v555_v46  ;;  %v1936_v62 = vsub.f32 %v1662_v39, %v430_v63 }
 0x130   :  { %v346_v25 = vpop.xlane.xlu0 %345  ;;  %v348_v55 = vpop.xlane.xlu1 %347 }
 0x131   :  { %v431_v27 = vmul.f32 0.0078125, %v346_v25  ;;  %v557_v52 = vmul.f32 %v1931_v19, %v1931_v19  ;;  %v432_v13 = vmul.f32 0.0078125, %v348_v55  ;;  %v558_v38 = vmul.f32 %v1936_v62, %v1936_v62 }
 0x133   :  { %v1941_v45 = vsub.f32 %v1665_v50, %v431_v27  ;;  %659 = vadd.xlane.f32.xlu1 %v556_v24  ;;  %661 = vadd.xlane.f32.xlu0 %v557_v52  ;;  %v1946_v12 = vsub.f32 %v1668_v51, %v432_v13 }
 0x134   :  { %v350_v39 = vpop.xlane.xlu0 %349  ;;  %v352_v63 = vpop.xlane.xlu1 %351 }
 0x135   :  { %v433_v37 = vmul.f32 0.0078125, %v350_v39  ;;  %v559_v46 = vmul.f32 %v1941_v45, %v1941_v45  ;;  %v434_v25 = vmul.f32 0.0078125, %v352_v63  ;;  %v560_v50 = vmul.f32 %v1946_v12, %v1946_v12 }
 0x137   :  { %v1951_v55 = vsub.f32 %v1671_v2, %v433_v37  ;;  %663 = vadd.xlane.f32.xlu1 %v558_v38  ;;  %665 = vadd.xlane.f32.xlu0 %v559_v46  ;;  %v1956_v24 = vsub.f32 %v1674_v4, %v434_v25 }
 0x138   :  { %v354_v51 = vpop.xlane.xlu0 %353  ;;  %v356_v13 = vpop.xlane.xlu1 %355 }
 0x139   :  { %2299 = vst [vmem:[#allocation28_spill] sm:$0xff] %v1951_v55  ;;  %2300 = vst [vmem:[#allocation29_spill] sm:$0xff] %v1956_v24  ;;  %v435_v27 = vmul.f32 0.0078125, %v354_v51  ;;  %v561_v52 = vmul.f32 %v1951_v55, %v1951_v55  ;;  %v436_v39 = vmul.f32 0.0078125, %v356_v13  ;;  %v562_v2 = vmul.f32 %v1956_v24, %v1956_v24  ;;  %v2306_v24 = vld [vmem:[#allocation16_spill] sm:$0xff] }
 0x13b   :  { %v1961_v63 = vsub.f32 %v1677_v20, %v435_v27  ;;  %667 = vadd.xlane.f32.xlu1 %v560_v50  ;;  %669 = vadd.xlane.f32.xlu0 %v561_v52  ;;  %v1966_v38 = vsub.f32 %v1680_v21, %v436_v39  ;;  %v2304_v50 = vld [vmem:[#allocation15_spill] sm:$0xff] }
 0x13c   :  { %v358_v4 = vpop.xlane.xlu0 %357  ;;  %v360_v25 = vpop.xlane.xlu1 %359 }
 0x13d   :  { %2301 = vst [vmem:[#allocation30_spill] sm:$0xff] %v1961_v63  ;;  %2302 = vst [vmem:[#allocation31_spill] sm:$0xff] %v1966_v38  ;;  %v437_v37 = vmul.f32 0.0078125, %v358_v4  ;;  %v563_v46 = vmul.f32 %v1961_v63, %v1961_v63  ;;  %v438_v51 = vmul.f32 0.0078125, %v360_v25  ;;  %v564_v20 = vmul.f32 %v1966_v38, %v1966_v38  ;;  %v2310_v38 = vld [vmem:[#allocation18_spill] sm:$0xff] }
 0x13f   :  { %v1971_v13 = vsub.f32 %v1683_v42, %v437_v37  ;;  %671 = vadd.xlane.f32.xlu1 %v562_v2  ;;  %673 = vadd.xlane.f32.xlu0 %v563_v46  ;;  %v1976_v27 = vsub.f32 %v2304_v50, %v438_v51  ;;  %v2308_v2 = vld [vmem:[#allocation17_spill] sm:$0xff] }
 0x140   :  { %v362_v21 = vpop.xlane.xlu0 %361  ;;  %v364_v4 = vpop.xlane.xlu1 %363 }
 0x141   :  { %2303 = vst [vmem:[#allocation32_spill] sm:$0xff] %v1971_v13  ;;  %2305 = vst [vmem:[#allocation15_spill] sm:$0xff] %v1976_v27  ;;  %v439_v52 = vmul.f32 0.0078125, %v362_v21  ;;  %v565_v39 = vmul.f32 %v1971_v13, %v1971_v13  ;;  %v440_v63 = vmul.f32 0.0078125, %v364_v4  ;;  %v566_v42 = vmul.f32 %v1976_v27, %v1976_v27  ;;  %v2314_v27 = vld [vmem:[#allocation20_spill] sm:$0xff] }
 0x143   :  { %v1981_v25 = vsub.f32 %v2306_v24, %v439_v52  ;;  %675 = vadd.xlane.f32.xlu1 %v564_v20  ;;  %677 = vadd.xlane.f32.xlu0 %v565_v39  ;;  %v1986_v37 = vsub.f32 %v2308_v2, %v440_v63  ;;  %v2312_v20 = vld [vmem:[#allocation19_spill] sm:$0xff] }
 0x144   :  { %v366_v46 = vpop.xlane.xlu0 %365  ;;  %v368_v21 = vpop.xlane.xlu1 %367 }
 0x145   :  { %2307 = vst [vmem:[#allocation16_spill] sm:$0xff] %v1981_v25  ;;  %2309 = vst [vmem:[#allocation17_spill] sm:$0xff] %v1986_v37  ;;  %v441_v51 = vmul.f32 0.0078125, %v366_v46  ;;  %v567_v50 = vmul.f32 %v1981_v25, %v1981_v25  ;;  %v442_v13 = vmul.f32 0.0078125, %v368_v21  ;;  %v568_v24 = vmul.f32 %v1986_v37, %v1986_v37  ;;  %v2318_v37 = vld [vmem:[#allocation22_spill] sm:$0xff] }
 0x147   :  { %v1991_v4 = vsub.f32 %v2310_v38, %v441_v51  ;;  %679 = vadd.xlane.f32.xlu1 %v566_v42  ;;  %681 = vadd.xlane.f32.xlu0 %v567_v50  ;;  %v1996_v52 = vsub.f32 %v2312_v20, %v442_v13  ;;  %v2316_v42 = vld [vmem:[#allocation21_spill] sm:$0xff] }
 0x148   :  { %v370_v63 = vpop.xlane.xlu0 %369  ;;  %v372_v46 = vpop.xlane.xlu1 %371 }
 0x149   :  { %2311 = vst [vmem:[#allocation18_spill] sm:$0xff] %v1991_v4  ;;  %2313 = vst [vmem:[#allocation19_spill] sm:$0xff] %v1996_v52  ;;  %v443_v39 = vmul.f32 0.0078125, %v370_v63  ;;  %v569_v2 = vmul.f32 %v1991_v4, %v1991_v4  ;;  %v444_v25 = vmul.f32 0.0078125, %v372_v46  ;;  %v570_v38 = vmul.f32 %v1996_v52, %v1996_v52 }
 0x14b   :  { %v2001_v21 = vsub.f32 %v2314_v27, %v443_v39  ;;  %683 = vadd.xlane.f32.xlu1 %v568_v24  ;;  %685 = vadd.xlane.f32.xlu0 %v569_v2  ;;  %v2006_v51 = vsub.f32 %v2316_v42, %v444_v25 }
 0x14c   :  { %v374_v13 = vpop.xlane.xlu0 %373  ;;  %v376_v63 = vpop.xlane.xlu1 %375 }
 0x14d   :  { %2315 = vst [vmem:[#allocation20_spill] sm:$0xff] %v2001_v21  ;;  %2317 = vst [vmem:[#allocation21_spill] sm:$0xff] %v2006_v51  ;;  %v445_v50 = vmul.f32 0.0078125, %v374_v13  ;;  %v571_v20 = vmul.f32 %v2001_v21, %v2001_v21  ;;  %v446_v4 = vmul.f32 0.0078125, %v376_v63  ;;  %v572_v27 = vmul.f32 %v2006_v51, %v2006_v51  ;;  %v2321_v21 = vld [vmem:[#allocation23_spill] sm:$0xff]  ;;  %v2325_v51 = vld [vmem:[#allocation25_spill] sm:$0xff] }
 0x14f   :  { %v2011_v46 = vsub.f32 %v2318_v37, %v445_v50  ;;  %687 = vadd.xlane.f32.xlu1 %v570_v38  ;;  %689 = vadd.xlane.f32.xlu0 %v571_v20  ;;  %v2016_v24 = vsub.f32 %v1710_v15, %v446_v4  ;;  %v2323_v38 = vld [vmem:[#allocation24_spill] sm:$0xff] }
 0x150   :  { %v378_v25 = vpop.xlane.xlu0 %377  ;;  %v380_v42 = vpop.xlane.xlu1 %379 }
 0x151   :  { %2319 = vst [vmem:[#allocation22_spill] sm:$0xff] %v2011_v46  ;;  %2320 = vst [vmem:[#allocation33_spill] sm:$0xff] %v2016_v24  ;;  %v447_v39 = vmul.f32 0.0078125, %v378_v25  ;;  %v573_v2 = vmul.f32 %v2011_v46, %v2011_v46  ;;  %v448_v13 = vmul.f32 0.0078125, %v380_v42  ;;  %v574_v37 = vmul.f32 %v2016_v24, %v2016_v24 }
 0x153   :  { %v2021_v63 = vsub.f32 %v2321_v21, %v447_v39  ;;  %691 = vadd.xlane.f32.xlu1 %v572_v27  ;;  %693 = vadd.xlane.f32.xlu0 %v573_v2  ;;  %v2026_v50 = vsub.f32 %v2323_v38, %v448_v13 }
 0x154   :  { %v382_v15 = vpop.xlane.xlu0 %381  ;;  %v384_v25 = vpop.xlane.xlu1 %383 }
 0x155   :  { %2322 = vst [vmem:[#allocation23_spill] sm:$0xff] %v2021_v63  ;;  %2324 = vst [vmem:[#allocation24_spill] sm:$0xff] %v2026_v50  ;;  %v449_v4 = vmul.f32 0.0078125, %v382_v15  ;;  %v575_v20 = vmul.f32 %v2021_v63, %v2021_v63  ;;  %v450_v46 = vmul.f32 0.0078125, %v384_v25  ;;  %v576_v21 = vmul.f32 %v2026_v50, %v2026_v50 }
 0x157   :  { %v2031_v42 = vsub.f32 %v2325_v51, %v449_v4  ;;  %695 = vadd.xlane.f32.xlu1 %v574_v37  ;;  %697 = vadd.xlane.f32.xlu0 %v575_v20  ;;  %v2036_v27 = vsub.f32 %v1722_v6, %v450_v46  ;;  %v2329_v37 = vld [vmem:[#allocation26_spill] sm:$0xff] }
 0x158   :  { %v386_v39 = vpop.xlane.xlu0 %385  ;;  %v388_v38 = vpop.xlane.xlu1 %387 }
 0x159   :  { %2326 = vst [vmem:[#allocation25_spill] sm:$0xff] %v2031_v42  ;;  %2327 = vst [vmem:[#allocation34_spill] sm:$0xff] %v2036_v27  ;;  %v451_v2 = vmul.f32 0.0078125, %v386_v39  ;;  %v577_v13 = vmul.f32 %v2031_v42, %v2031_v42  ;;  %v452_v15 = vmul.f32 0.0078125, %v388_v38  ;;  %v578_v51 = vmul.f32 %v2036_v27, %v2036_v27 }
 0x15b   :  { %v2041_v25 = vsub.f32 %v1725_v32, %v451_v2  ;;  %699 = vadd.xlane.f32.xlu1 %v576_v21  ;;  %701 = vadd.xlane.f32.xlu0 %v577_v13  ;;  %v2046_v4 = vsub.f32 %v2329_v37, %v452_v15 }
 0x15d   :  { %2328 = vst [vmem:[#allocation35_spill] sm:$0xff] %v2041_v25  ;;  %2330 = vst [vmem:[#allocation26_spill] sm:$0xff] %v2046_v4  ;;  %v579_v6 = vmul.f32 %v2041_v25, %v2041_v25  ;;  %v580_v46 = vmul.f32 %v2046_v4, %v2046_v4 }
 0x15f   :  { %703 = vadd.xlane.f32.xlu1 %v578_v51  ;;  %705 = vadd.xlane.f32.xlu0 %v579_v6 }
 0x163   :  { %707 = vadd.xlane.f32.xlu1 %v580_v46 }
 0x170   :  { %v582_v20 = vpop.xlane.xlu0 %581 }
 0x171   :  { %v709_v32 = vmul.f32 0.0078125, %v582_v20 }
 0x173   :  { %v773_v39 = vadd.f32 1e-05, %v709_v32 }
 0x174   :  { %v584_v21 = vpop.xlane.xlu1 %583  ;;  %v586_v2 = vpop.xlane.xlu0 %585 }
 0x175   :  { %1199 = vrsqrt.f32 %v773_v39  ;;  %v710_v13 = vmul.f32 0.0078125, %v584_v21  ;;  %v711_v38 = vmul.f32 0.0078125, %v586_v2  ;;  %v2052_v39 = vld [vmem:[#allocation7] ss:$0 sm:$0xff] }
 0x177   :  { %v774_v27 = vadd.f32 1e-05, %v710_v13  ;;  %v775_v15 = vadd.f32 1e-05, %v711_v38 }
 0x178   :  { %v588_v37 = vpop.xlane.xlu1 %587  ;;  %v590_v42 = vpop.xlane.xlu0 %589 }
 0x179   :  { %1201 = vrsqrt.f32 %v774_v27  ;;  %v712_v25 = vmul.f32 0.0078125, %v588_v37  ;;  %v713_v51 = vmul.f32 0.0078125, %v590_v42  ;;  %v2055_v37 = vld [vmem:[#allocation8] ss:$0 sm:$0xff] }
 0x17a   :  { %1203 = vrsqrt.f32 %v775_v15 }
 0x17b   :  { %v776_v6 = vadd.f32 1e-05, %v712_v25  ;;  %v777_v50 = vadd.f32 1e-05, %v713_v51 }
 0x17c   :  { %v592_v4 = vpop.xlane.xlu1 %591  ;;  %v594_v46 = vpop.xlane.xlu0 %593 }
 0x17d   :  { %1205 = vrsqrt.f32 %v776_v6  ;;  %v714_v20 = vmul.f32 0.0078125, %v592_v4  ;;  %v715_v32 = vmul.f32 0.0078125, %v594_v46 }
 0x17e   :  { %1207 = vrsqrt.f32 %v777_v50 }
 0x17f   :  { %v1200_v63 = vpop.eup %1199  ;;  %v778_v21 = vadd.f32 1e-05, %v714_v20  ;;  %v779_v2 = vadd.f32 1e-05, %v715_v32 }
 0x180   :  { %v901_v13 = vmul.f32 %v1200_v63, %v1733_v49  ;;  %v596_v38 = vpop.xlane.xlu1 %595  ;;  %v598_v27 = vpop.xlane.xlu0 %597  ;;  %v2331_v63 = vld [vmem:[#allocation27_spill] sm:$0xff] }
 0x181   :  { %1209 = vrsqrt.f32 %v778_v21  ;;  %v716_v42 = vmul.f32 0.0078125, %v596_v38  ;;  %v717_v25 = vmul.f32 0.0078125, %v598_v27 }
 0x182   :  { %v972_v15 = vmul.f32 %v2052_v39, %v901_v13  ;;  %1211 = vrsqrt.f32 %v779_v2 }
 0x183   :  { %v1202_v4 = vpop.eup %1201  ;;  %v780_v51 = vadd.f32 1e-05, %v716_v42  ;;  %v781_v50 = vadd.f32 1e-05, %v717_v25 }
 0x184   :  { %v1204_v6 = vpop.eup %1203  ;;  %v1043_v46 = vadd.f32 %v2055_v37, %v972_v15  ;;  %v902_v20 = vmul.f32 %v1202_v4, %v1743_v31  ;;  %v600_v32 = vpop.xlane.xlu1 %599 }
 0x185   :  { %v602_v49 = vpop.xlane.xlu0 %601  ;;  %v903_v24 = vmul.f32 %v1204_v6, %v2331_v63  ;;  %1213 = vrsqrt.f32 %v780_v51  ;;  %v718_v52 = vmul.f32 0.0078125, %v600_v32 }
 0x186   :  { %v719_v21 = vmul.f32 0.0078125, %v602_v49  ;;  %1107 = vst [vmem:[#allocation10] sm:$0xff] %v1043_v46  ;;  %v973_v38 = vmul.f32 %v2052_v39, %v902_v20  ;;  %1215 = vrsqrt.f32 %v781_v50 }
 0x187   :  { %v1206_v2 = vpop.eup %1205  ;;  %v974_v13 = vmul.f32 %v2052_v39, %v903_v24  ;;  %v782_v27 = vadd.f32 1e-05, %v718_v52 }
 0x188   :  { %v783_v42 = vadd.f32 1e-05, %v719_v21  ;;  %v1208_v25 = vpop.eup %1207  ;;  %v1044_v15 = vadd.f32 %v2055_v37, %v973_v38  ;;  %v904_v31 = vmul.f32 %v1206_v2, %v1746_v3  ;;  %v604_v4 = vpop.xlane.xlu1 %603 }
 0x189   :  { %v606_v55 = vpop.xlane.xlu0 %605  ;;  %v1045_v51 = vadd.f32 %v2055_v37, %v974_v13  ;;  %v905_v6 = vmul.f32 %v1208_v25, %v1753_v61  ;;  %1217 = vrsqrt.f32 %v782_v27  ;;  %v720_v46 = vmul.f32 0.0078125, %v604_v4 }
 0x18a   :  { %1108 = vst [vmem:[#allocation10 + $0x8] sm:$0xff] %v1044_v15  ;;  %v975_v50 = vmul.f32 %v2052_v39, %v904_v31  ;;  %1219 = vrsqrt.f32 %v783_v42  ;;  %v721_v24 = vmul.f32 0.0078125, %v606_v55 }
 0x18b   :  { %v1210_v52 = vpop.eup %1209  ;;  %1109 = vst [vmem:[#allocation10 + $0x10] sm:$0xff] %v1045_v51  ;;  %v976_v20 = vmul.f32 %v2052_v39, %v905_v6  ;;  %v784_v32 = vadd.f32 1e-05, %v720_v46 }
 0x18c   :  { %v1212_v49 = vpop.eup %1211  ;;  %v1046_v3 = vadd.f32 %v2055_v37, %v975_v50  ;;  %v906_v63 = vmul.f32 %v1210_v52, %v1756_v57  ;;  %v785_v21 = vadd.f32 1e-05, %v721_v24  ;;  %v608_v38 = vpop.xlane.xlu1 %607 }
 0x18d   :  { %v610_v61 = vpop.xlane.xlu0 %609  ;;  %v1047_v2 = vadd.f32 %v2055_v37, %v976_v20  ;;  %v907_v13 = vmul.f32 %v1212_v49, %v1763_v7  ;;  %1221 = vrsqrt.f32 %v784_v32  ;;  %v722_v27 = vmul.f32 0.0078125, %v608_v38 }
 0x18e   :  { %1110 = vst [vmem:[#allocation10 + $0x18] sm:$0xff] %v1046_v3  ;;  %v977_v55 = vmul.f32 %v2052_v39, %v906_v63  ;;  %1223 = vrsqrt.f32 %v785_v21  ;;  %v723_v42 = vmul.f32 0.0078125, %v610_v61 }
 0x18f   :  { %v1214_v25 = vpop.eup %1213  ;;  %1111 = vst [vmem:[#allocation10 + $0x20] sm:$0xff] %v1047_v2  ;;  %v978_v15 = vmul.f32 %v2052_v39, %v907_v13  ;;  %v786_v31 = vadd.f32 1e-05, %v722_v27 }
 0x190   :  { %v1216_v57 = vpop.eup %1215  ;;  %v1048_v4 = vadd.f32 %v2055_v37, %v977_v55  ;;  %v908_v51 = vmul.f32 %v1214_v25, %v1766_v56  ;;  %v787_v6 = vadd.f32 1e-05, %v723_v42  ;;  %v612_v46 = vpop.xlane.xlu1 %611 }
 0x191   :  { %v614_v7 = vpop.xlane.xlu0 %613  ;;  %v1049_v50 = vadd.f32 %v2055_v37, %v978_v15  ;;  %v909_v24 = vmul.f32 %v1216_v57, %v1773_v30  ;;  %1225 = vrsqrt.f32 %v786_v31  ;;  %v724_v52 = vmul.f32 0.0078125, %v612_v46 }
 0x192   :  { %1112 = vst [vmem:[#allocation10 + $0x28] sm:$0xff] %v1048_v4  ;;  %v979_v20 = vmul.f32 %v2052_v39, %v908_v51  ;;  %1227 = vrsqrt.f32 %v787_v6  ;;  %v725_v32 = vmul.f32 0.0078125, %v614_v7 }
 0x193   :  { %v1218_v49 = vpop.eup %1217  ;;  %1113 = vst [vmem:[#allocation10 + $0x30] sm:$0xff] %v1049_v50  ;;  %v980_v3 = vmul.f32 %v2052_v39, %v909_v24  ;;  %v788_v63 = vadd.f32 1e-05, %v724_v52 }
 0x194   :  { %v1220_v56 = vpop.eup %1219  ;;  %v1050_v21 = vadd.f32 %v2055_v37, %v979_v20  ;;  %v910_v38 = vmul.f32 %v1218_v49, %v1776_v11  ;;  %v789_v61 = vadd.f32 1e-05, %v725_v32  ;;  %v616_v2 = vpop.xlane.xlu1 %615 }
 0x195   :  { %v618_v30 = vpop.xlane.xlu0 %617  ;;  %v1051_v13 = vadd.f32 %v2055_v37, %v980_v3  ;;  %v911_v27 = vmul.f32 %v1220_v56, %v1783_v48  ;;  %1229 = vrsqrt.f32 %v788_v63  ;;  %v726_v55 = vmul.f32 0.0078125, %v616_v2 }
 0x196   :  { %1114 = vst [vmem:[#allocation10 + $0x38] sm:$0xff] %v1050_v21  ;;  %v981_v42 = vmul.f32 %v2052_v39, %v910_v38  ;;  %1231 = vrsqrt.f32 %v789_v61  ;;  %v727_v25 = vmul.f32 0.0078125, %v618_v30 }
 0x197   :  { %v1222_v15 = vpop.eup %1221  ;;  %1115 = vst [vmem:[#allocation10 + $0x40] sm:$0xff] %v1051_v13  ;;  %v982_v31 = vmul.f32 %v2052_v39, %v911_v27  ;;  %v790_v57 = vadd.f32 1e-05, %v726_v55 }
 0x198   :  { %v1224_v11 = vpop.eup %1223  ;;  %v1052_v4 = vadd.f32 %v2055_v37, %v981_v42  ;;  %v912_v51 = vmul.f32 %v1222_v15, %v1786_v17  ;;  %v791_v6 = vadd.f32 1e-05, %v727_v25  ;;  %v620_v46 = vpop.xlane.xlu1 %619 }
 0x199   :  { %v622_v48 = vpop.xlane.xlu0 %621  ;;  %v1053_v7 = vadd.f32 %v2055_v37, %v982_v31  ;;  %v913_v50 = vmul.f32 %v1224_v11, %v1793_v5  ;;  %1233 = vrsqrt.f32 %v790_v57  ;;  %v728_v24 = vmul.f32 0.0078125, %v620_v46 }
 0x19a   :  { %1116 = vst [vmem:[#allocation10 + $0x48] sm:$0xff] %v1052_v4  ;;  %v983_v52 = vmul.f32 %v2052_v39, %v912_v51  ;;  %1235 = vrsqrt.f32 %v791_v6  ;;  %v729_v20 = vmul.f32 0.0078125, %v622_v48 }
 0x19b   :  { %v1226_v32 = vpop.eup %1225  ;;  %1117 = vst [vmem:[#allocation10 + $0x50] sm:$0xff] %v1053_v7  ;;  %v984_v49 = vmul.f32 %v2052_v39, %v913_v50  ;;  %v792_v3 = vadd.f32 1e-05, %v728_v24 }
 0x19c   :  { %v1228_v17 = vpop.eup %1227  ;;  %v1054_v63 = vadd.f32 %v2055_v37, %v983_v52  ;;  %v914_v56 = vmul.f32 %v1226_v32, %v1796_v23  ;;  %v793_v21 = vadd.f32 1e-05, %v729_v20  ;;  %v624_v38 = vpop.xlane.xlu1 %623 }
 0x19d   :  { %v626_v5 = vpop.xlane.xlu0 %625  ;;  %v1055_v61 = vadd.f32 %v2055_v37, %v984_v49  ;;  %v915_v2 = vmul.f32 %v1228_v17, %v1803_v60  ;;  %1237 = vrsqrt.f32 %v792_v3  ;;  %v730_v30 = vmul.f32 0.0078125, %v624_v38 }
 0x19e   :  { %1118 = vst [vmem:[#allocation10 + $0x58] sm:$0xff] %v1054_v63  ;;  %v985_v13 = vmul.f32 %v2052_v39, %v914_v56  ;;  %1239 = vrsqrt.f32 %v793_v21  ;;  %v731_v27 = vmul.f32 0.0078125, %v626_v5 }
 0x19f   :  { %v1230_v55 = vpop.eup %1229  ;;  %1119 = vst [vmem:[#allocation10 + $0x60] sm:$0xff] %v1055_v61  ;;  %v986_v42 = vmul.f32 %v2052_v39, %v915_v2  ;;  %v794_v25 = vadd.f32 1e-05, %v730_v30 }
 0x1a0   :  { %v1232_v23 = vpop.eup %1231  ;;  %v1056_v15 = vadd.f32 %v2055_v37, %v985_v13  ;;  %v916_v31 = vmul.f32 %v1230_v55, %v1806_v29  ;;  %v795_v57 = vadd.f32 1e-05, %v731_v27  ;;  %v628_v11 = vpop.xlane.xlu1 %627 }
 0x1a1   :  { %v630_v60 = vpop.xlane.xlu0 %629  ;;  %v1057_v4 = vadd.f32 %v2055_v37, %v986_v42  ;;  %v917_v51 = vmul.f32 %v1232_v23, %v1813_v43  ;;  %1241 = vrsqrt.f32 %v794_v25  ;;  %v732_v6 = vmul.f32 0.0078125, %v628_v11 }
 0x1a2   :  { %1120 = vst [vmem:[#allocation10 + $0x68] sm:$0xff] %v1056_v15  ;;  %v987_v46 = vmul.f32 %v2052_v39, %v916_v31  ;;  %1243 = vrsqrt.f32 %v795_v57  ;;  %v733_v48 = vmul.f32 0.0078125, %v630_v60 }
 0x1a3   :  { %v1234_v7 = vpop.eup %1233  ;;  %1121 = vst [vmem:[#allocation10 + $0x70] sm:$0xff] %v1057_v4  ;;  %v988_v50 = vmul.f32 %v2052_v39, %v917_v51  ;;  %v796_v24 = vadd.f32 1e-05, %v732_v6 }
 0x1a4   :  { %v1236_v29 = vpop.eup %1235  ;;  %v1058_v52 = vadd.f32 %v2055_v37, %v987_v46  ;;  %v918_v20 = vmul.f32 %v1234_v7, %v1816_v35  ;;  %v797_v32 = vadd.f32 1e-05, %v733_v48  ;;  %v632_v49 = vpop.xlane.xlu1 %631 }
 0x1a5   :  { %v634_v43 = vpop.xlane.xlu0 %633  ;;  %v1059_v3 = vadd.f32 %v2055_v37, %v988_v50  ;;  %v919_v17 = vmul.f32 %v1236_v29, %v1823_v10  ;;  %1245 = vrsqrt.f32 %v796_v24  ;;  %v734_v63 = vmul.f32 0.0078125, %v632_v49 }
 0x1a6   :  { %1122 = vst [vmem:[#allocation10 + $0x78] sm:$0xff] %v1058_v52  ;;  %v989_v56 = vmul.f32 %v2052_v39, %v918_v20  ;;  %1247 = vrsqrt.f32 %v797_v32  ;;  %v735_v21 = vmul.f32 0.0078125, %v634_v43 }
 0x1a7   :  { %v1238_v38 = vpop.eup %1237  ;;  %1123 = vst [vmem:[#allocation10 + $0x80] sm:$0xff] %v1059_v3  ;;  %v990_v5 = vmul.f32 %v2052_v39, %v919_v17  ;;  %v798_v61 = vadd.f32 1e-05, %v734_v63 }
 0x1a8   :  { %v1240_v35 = vpop.eup %1239  ;;  %v1060_v2 = vadd.f32 %v2055_v37, %v989_v56  ;;  %v920_v30 = vmul.f32 %v1238_v38, %v1826_v41  ;;  %v799_v13 = vadd.f32 1e-05, %v735_v21  ;;  %v636_v27 = vpop.xlane.xlu1 %635 }
 0x1a9   :  { %v638_v10 = vpop.xlane.xlu0 %637  ;;  %v1061_v55 = vadd.f32 %v2055_v37, %v990_v5  ;;  %v921_v42 = vmul.f32 %v1240_v35, %v1833_v16  ;;  %1249 = vrsqrt.f32 %v798_v61  ;;  %v736_v25 = vmul.f32 0.0078125, %v636_v27 }
 0x1aa   :  { %1124 = vst [vmem:[#allocation10 + $0x88] sm:$0xff] %v1060_v2  ;;  %v991_v23 = vmul.f32 %v2052_v39, %v920_v30  ;;  %1251 = vrsqrt.f32 %v799_v13  ;;  %v737_v15 = vmul.f32 0.0078125, %v638_v10 }
 0x1ab   :  { %v1242_v31 = vpop.eup %1241  ;;  %1125 = vst [vmem:[#allocation10 + $0x90] sm:$0xff] %v1061_v55  ;;  %v992_v57 = vmul.f32 %v2052_v39, %v921_v42  ;;  %v800_v11 = vadd.f32 1e-05, %v736_v25 }
 0x1ac   :  { %v1244_v41 = vpop.eup %1243  ;;  %v1062_v60 = vadd.f32 %v2055_v37, %v991_v23  ;;  %v922_v4 = vmul.f32 %v1242_v31, %v1836_v47  ;;  %v801_v51 = vadd.f32 1e-05, %v737_v15  ;;  %v640_v6 = vpop.xlane.xlu1 %639 }
 0x1ad   :  { %v642_v16 = vpop.xlane.xlu0 %641  ;;  %v1063_v46 = vadd.f32 %v2055_v37, %v992_v57  ;;  %v923_v48 = vmul.f32 %v1244_v41, %v1843_v22  ;;  %1253 = vrsqrt.f32 %v800_v11  ;;  %v738_v7 = vmul.f32 0.0078125, %v640_v6 }
 0x1ae   :  { %1126 = vst [vmem:[#allocation10 + $0x98] sm:$0xff] %v1062_v60  ;;  %v993_v50 = vmul.f32 %v2052_v39, %v922_v4  ;;  %1255 = vrsqrt.f32 %v801_v51  ;;  %v739_v24 = vmul.f32 0.0078125, %v642_v16 }
 0x1af   :  { %v1246_v29 = vpop.eup %1245  ;;  %1127 = vst [vmem:[#allocation10 + $0xa0] sm:$0xff] %v1063_v46  ;;  %v994_v52 = vmul.f32 %v2052_v39, %v923_v48  ;;  %v802_v20 = vadd.f32 1e-05, %v738_v7 }
 0x1b0   :  { %v1248_v47 = vpop.eup %1247  ;;  %v1064_v32 = vadd.f32 %v2055_v37, %v993_v50  ;;  %v924_v49 = vmul.f32 %v1246_v29, %v1846_v53  ;;  %v803_v43 = vadd.f32 1e-05, %v739_v24  ;;  %v644_v3 = vpop.xlane.xlu1 %643 }
 0x1b1   :  { %v646_v22 = vpop.xlane.xlu0 %645  ;;  %v1065_v17 = vadd.f32 %v2055_v37, %v994_v52  ;;  %v925_v63 = vmul.f32 %v1248_v47, %v1853_v28  ;;  %1257 = vrsqrt.f32 %v802_v20  ;;  %v740_v56 = vmul.f32 0.0078125, %v644_v3 }
 0x1b2   :  { %1128 = vst [vmem:[#allocation10 + $0xa8] sm:$0xff] %v1064_v32  ;;  %v995_v21 = vmul.f32 %v2052_v39, %v924_v49  ;;  %1259 = vrsqrt.f32 %v803_v43  ;;  %v741_v38 = vmul.f32 0.0078125, %v646_v22 }
 0x1b3   :  { %v1250_v5 = vpop.eup %1249  ;;  %1129 = vst [vmem:[#allocation10 + $0xb0] sm:$0xff] %v1065_v17  ;;  %v996_v61 = vmul.f32 %v2052_v39, %v925_v63  ;;  %v804_v35 = vadd.f32 1e-05, %v740_v56 }
 0x1b4   :  { %v1252_v53 = vpop.eup %1251  ;;  %v1066_v2 = vadd.f32 %v2055_v37, %v995_v21  ;;  %v926_v30 = vmul.f32 %v1250_v5, %v1856_v59  ;;  %v805_v13 = vadd.f32 1e-05, %v741_v38  ;;  %v648_v27 = vpop.xlane.xlu1 %647 }
 0x1b5   :  { %v650_v28 = vpop.xlane.xlu0 %649  ;;  %v1067_v10 = vadd.f32 %v2055_v37, %v996_v61  ;;  %v927_v55 = vmul.f32 %v1252_v53, %v1863_v34  ;;  %1261 = vrsqrt.f32 %v804_v35  ;;  %v742_v42 = vmul.f32 0.0078125, %v648_v27 }
 0x1b6   :  { %1130 = vst [vmem:[#allocation10 + $0xb8] sm:$0xff] %v1066_v2  ;;  %v997_v25 = vmul.f32 %v2052_v39, %v926_v30  ;;  %1263 = vrsqrt.f32 %v805_v13  ;;  %v743_v23 = vmul.f32 0.0078125, %v650_v28 }
 0x1b7   :  { %v1254_v15 = vpop.eup %1253  ;;  %1131 = vst [vmem:[#allocation10 + $0xc0] sm:$0xff] %v1067_v10  ;;  %v998_v31 = vmul.f32 %v2052_v39, %v927_v55  ;;  %v806_v57 = vadd.f32 1e-05, %v742_v42 }
 0x1b8   :  { %v1256_v59 = vpop.eup %1255  ;;  %v1068_v11 = vadd.f32 %v2055_v37, %v997_v25  ;;  %v928_v41 = vmul.f32 %v1254_v15, %v1866_v1  ;;  %v807_v60 = vadd.f32 1e-05, %v743_v23  ;;  %v652_v4 = vpop.xlane.xlu1 %651 }
 0x1b9   :  { %v654_v34 = vpop.xlane.xlu0 %653  ;;  %v1069_v51 = vadd.f32 %v2055_v37, %v998_v31  ;;  %v929_v6 = vmul.f32 %v1256_v59, %v1873_v40  ;;  %1265 = vrsqrt.f32 %v806_v57  ;;  %v744_v16 = vmul.f32 0.0078125, %v652_v4 }
 0x1ba   :  { %1132 = vst [vmem:[#allocation10 + $0xc8] sm:$0xff] %v1068_v11  ;;  %v999_v46 = vmul.f32 %v2052_v39, %v928_v41  ;;  %1267 = vrsqrt.f32 %v807_v60  ;;  %v745_v48 = vmul.f32 0.0078125, %v654_v34 }
 0x1bb   :  { %v1258_v7 = vpop.eup %1257  ;;  %1133 = vst [vmem:[#allocation10 + $0xd0] sm:$0xff] %v1069_v51  ;;  %v1000_v50 = vmul.f32 %v2052_v39, %v929_v6  ;;  %v808_v24 = vadd.f32 1e-05, %v744_v16 }
 0x1bc   :  { %v1260_v1 = vpop.eup %1259  ;;  %v1070_v29 = vadd.f32 %v2055_v37, %v999_v46  ;;  %v930_v52 = vmul.f32 %v1258_v7, %v1876_v9  ;;  %v809_v20 = vadd.f32 1e-05, %v745_v48  ;;  %v656_v47 = vpop.xlane.xlu1 %655 }
 0x1bd   :  { %v658_v40 = vpop.xlane.xlu0 %657  ;;  %v1071_v32 = vadd.f32 %v2055_v37, %v1000_v50  ;;  %v931_v49 = vmul.f32 %v1260_v1, %v1881_v58  ;;  %1269 = vrsqrt.f32 %v808_v24  ;;  %v746_v43 = vmul.f32 0.0078125, %v656_v47 }
 0x1be   :  { %1134 = vst [vmem:[#allocation10 + $0xd8] sm:$0xff] %v1070_v29  ;;  %v1001_v3 = vmul.f32 %v2052_v39, %v930_v52  ;;  %1271 = vrsqrt.f32 %v809_v20  ;;  %v747_v22 = vmul.f32 0.0078125, %v658_v40 }
 0x1bf   :  { %v1262_v17 = vpop.eup %1261  ;;  %1135 = vst [vmem:[#allocation10 + $0xe0] sm:$0xff] %v1071_v32  ;;  %v1002_v63 = vmul.f32 %v2052_v39, %v931_v49  ;;  %v810_v56 = vadd.f32 1e-05, %v746_v43 }
 0x1c0   :  { %v1264_v9 = vpop.eup %1263  ;;  %v1072_v21 = vadd.f32 %v2055_v37, %v1001_v3  ;;  %v932_v38 = vmul.f32 %v1262_v17, %v1886_v36  ;;  %v811_v5 = vadd.f32 1e-05, %v747_v22  ;;  %v660_v61 = vpop.xlane.xlu1 %659 }
 0x1c1   :  { %v662_v58 = vpop.xlane.xlu0 %661  ;;  %v1073_v35 = vadd.f32 %v2055_v37, %v1002_v63  ;;  %v933_v53 = vmul.f32 %v1264_v9, %v1891_v0  ;;  %1273 = vrsqrt.f32 %v810_v56  ;;  %v748_v2 = vmul.f32 0.0078125, %v660_v61 }
 0x1c2   :  { %1136 = vst [vmem:[#allocation10 + $0xe8] sm:$0xff] %v1072_v21  ;;  %v1003_v30 = vmul.f32 %v2052_v39, %v932_v38  ;;  %1275 = vrsqrt.f32 %v811_v5  ;;  %v749_v13 = vmul.f32 0.0078125, %v662_v58 }
 0x1c3   :  { %v1266_v27 = vpop.eup %1265  ;;  %1137 = vst [vmem:[#allocation10 + $0xf0] sm:$0xff] %v1073_v35  ;;  %v1004_v28 = vmul.f32 %v2052_v39, %v933_v53  ;;  %v812_v10 = vadd.f32 1e-05, %v748_v2 }
 0x1c4   :  { %v1268_v36 = vpop.eup %1267  ;;  %v1074_v55 = vadd.f32 %v2055_v37, %v1003_v30  ;;  %v934_v42 = vmul.f32 %v1266_v27, %v1896_v14  ;;  %v813_v25 = vadd.f32 1e-05, %v749_v13  ;;  %v664_v23 = vpop.xlane.xlu1 %663 }
 0x1c5   :  { %v666_v0 = vpop.xlane.xlu0 %665  ;;  %v1075_v15 = vadd.f32 %v2055_v37, %v1004_v28  ;;  %v935_v31 = vmul.f32 %v1268_v36, %v1901_v8  ;;  %1277 = vrsqrt.f32 %v812_v10  ;;  %v750_v57 = vmul.f32 0.0078125, %v664_v23 }
 0x1c6   :  { %1138 = vst [vmem:[#allocation10 + $0xf8] sm:$0xff] %v1074_v55  ;;  %v1005_v59 = vmul.f32 %v2052_v39, %v934_v42  ;;  %1279 = vrsqrt.f32 %v813_v25  ;;  %v751_v11 = vmul.f32 0.0078125, %v666_v0 }
 0x1c7   :  { %v1270_v41 = vpop.eup %1269  ;;  %1139 = vst [vmem:[#allocation10 + $0x100] sm:$0xff] %v1075_v15  ;;  %v1006_v60 = vmul.f32 %v2052_v39, %v935_v31  ;;  %v814_v4 = vadd.f32 1e-05, %v750_v57 }
 0x1c8   :  { %v1272_v14 = vpop.eup %1271  ;;  %v1076_v34 = vadd.f32 %v2055_v37, %v1005_v59  ;;  %v936_v51 = vmul.f32 %v1270_v41, %v1906_v33  ;;  %v815_v6 = vadd.f32 1e-05, %v751_v11  ;;  %v668_v16 = vpop.xlane.xlu1 %667 }
 0x1c9   :  { %v670_v8 = vpop.xlane.xlu0 %669  ;;  %v1077_v46 = vadd.f32 %v2055_v37, %v1006_v60  ;;  %v937_v48 = vmul.f32 %v1272_v14, %v1911_v18  ;;  %1281 = vrsqrt.f32 %v814_v4  ;;  %v752_v7 = vmul.f32 0.0078125, %v668_v16 }
 0x1ca   :  { %1140 = vst [vmem:[#allocation10 + $0x108] sm:$0xff] %v1076_v34  ;;  %v1007_v50 = vmul.f32 %v2052_v39, %v936_v51  ;;  %1283 = vrsqrt.f32 %v815_v6  ;;  %v753_v24 = vmul.f32 0.0078125, %v670_v8  ;;  %v2332_v51 = vld [vmem:[#allocation28_spill] sm:$0xff] }
 0x1cb   :  { %v1274_v1 = vpop.eup %1273  ;;  %1141 = vst [vmem:[#allocation10 + $0x110] sm:$0xff] %v1077_v46  ;;  %v1008_v29 = vmul.f32 %v2052_v39, %v937_v48  ;;  %v816_v52 = vadd.f32 1e-05, %v752_v7 }
 0x1cc   :  { %v1276_v33 = vpop.eup %1275  ;;  %v1078_v20 = vadd.f32 %v2055_v37, %v1007_v50  ;;  %v938_v47 = vmul.f32 %v1274_v1, %v1916_v44  ;;  %v817_v40 = vadd.f32 1e-05, %v753_v24  ;;  %v672_v32 = vpop.xlane.xlu1 %671  ;;  %v2333_v1 = vld [vmem:[#allocation29_spill] sm:$0xff] }
 0x1cd   :  { %v674_v18 = vpop.xlane.xlu0 %673  ;;  %v1079_v49 = vadd.f32 %v2055_v37, %v1008_v29  ;;  %v939_v43 = vmul.f32 %v1276_v33, %v1921_v26  ;;  %1285 = vrsqrt.f32 %v816_v52  ;;  %v754_v3 = vmul.f32 0.0078125, %v672_v32 }
 0x1ce   :  { %1142 = vst [vmem:[#allocation10 + $0x118] sm:$0xff] %v1078_v20  ;;  %v1009_v22 = vmul.f32 %v2052_v39, %v938_v47  ;;  %1287 = vrsqrt.f32 %v817_v40  ;;  %v755_v17 = vmul.f32 0.0078125, %v674_v18  ;;  %v2334_v40 = vld [vmem:[#allocation30_spill] sm:$0xff] }
 0x1cf   :  { %v1278_v63 = vpop.eup %1277  ;;  %1143 = vst [vmem:[#allocation10 + $0x120] sm:$0xff] %v1079_v49  ;;  %v1010_v56 = vmul.f32 %v2052_v39, %v939_v43  ;;  %v818_v9 = vadd.f32 1e-05, %v754_v3 }
 0x1d0   :  { %v1280_v44 = vpop.eup %1279  ;;  %v1080_v21 = vadd.f32 %v2055_v37, %v1009_v22  ;;  %v940_v38 = vmul.f32 %v1278_v63, %v1926_v54  ;;  %v819_v5 = vadd.f32 1e-05, %v755_v17  ;;  %v676_v61 = vpop.xlane.xlu1 %675 }
 0x1d1   :  { %v678_v26 = vpop.xlane.xlu0 %677  ;;  %v1081_v58 = vadd.f32 %v2055_v37, %v1010_v56  ;;  %v941_v35 = vmul.f32 %v1280_v44, %v1931_v19  ;;  %1289 = vrsqrt.f32 %v818_v9  ;;  %v756_v53 = vmul.f32 0.0078125, %v676_v61  ;;  %v2335_v9 = vld [vmem:[#allocation31_spill] sm:$0xff] }
 0x1d2   :  { %1144 = vst [vmem:[#allocation10 + $0x128] sm:$0xff] %v1080_v21  ;;  %v1011_v2 = vmul.f32 %v2052_v39, %v940_v38  ;;  %1291 = vrsqrt.f32 %v819_v5  ;;  %v757_v30 = vmul.f32 0.0078125, %v678_v26  ;;  %v2336_v26 = vld [vmem:[#allocation32_spill] sm:$0xff] }
 0x1d3   :  { %v1282_v13 = vpop.eup %1281  ;;  %1145 = vst [vmem:[#allocation10 + $0x130] sm:$0xff] %v1081_v58  ;;  %v1012_v27 = vmul.f32 %v2052_v39, %v941_v35  ;;  %v820_v28 = vadd.f32 1e-05, %v756_v53 }
 0x1d4   :  { %v1284_v54 = vpop.eup %1283  ;;  %v1082_v10 = vadd.f32 %v2055_v37, %v1011_v2  ;;  %v942_v36 = vmul.f32 %v1282_v13, %v1936_v62  ;;  %v821_v55 = vadd.f32 1e-05, %v757_v30  ;;  %v680_v42 = vpop.xlane.xlu1 %679 }
 0x1d5   :  { %v682_v19 = vpop.xlane.xlu0 %681  ;;  %v1083_v25 = vadd.f32 %v2055_v37, %v1012_v27  ;;  %v943_v23 = vmul.f32 %v1284_v54, %v1941_v45  ;;  %1293 = vrsqrt.f32 %v820_v28  ;;  %v758_v0 = vmul.f32 0.0078125, %v680_v42 }
 0x1d6   :  { %1146 = vst [vmem:[#allocation10 + $0x138] sm:$0xff] %v1082_v10  ;;  %v1013_v15 = vmul.f32 %v2052_v39, %v942_v36  ;;  %1295 = vrsqrt.f32 %v821_v55  ;;  %v759_v31 = vmul.f32 0.0078125, %v682_v19  ;;  %v2337_v10 = vld [vmem:[#allocation15_spill] sm:$0xff] }
 0x1d7   :  { %v1286_v57 = vpop.eup %1285  ;;  %1147 = vst [vmem:[#allocation10 + $0x140] sm:$0xff] %v1083_v25  ;;  %v1014_v59 = vmul.f32 %v2052_v39, %v943_v23  ;;  %v822_v11 = vadd.f32 1e-05, %v758_v0  ;;  %v2338_v23 = vld [vmem:[#allocation16_spill] sm:$0xff] }
 0x1d8   :  { %v1288_v62 = vpop.eup %1287  ;;  %v1084_v41 = vadd.f32 %v2055_v37, %v1013_v15  ;;  %v944_v60 = vmul.f32 %v1286_v57, %v1946_v12  ;;  %v823_v4 = vadd.f32 1e-05, %v759_v31  ;;  %v684_v14 = vpop.xlane.xlu1 %683 }
 0x1d9   :  { %v686_v45 = vpop.xlane.xlu0 %685  ;;  %v1085_v34 = vadd.f32 %v2055_v37, %v1014_v59  ;;  %v945_v6 = vmul.f32 %v1288_v62, %v2332_v51  ;;  %1297 = vrsqrt.f32 %v822_v11  ;;  %v760_v16 = vmul.f32 0.0078125, %v684_v14 }
 0x1da   :  { %1148 = vst [vmem:[#allocation10 + $0x148] sm:$0xff] %v1084_v41  ;;  %v1015_v8 = vmul.f32 %v2052_v39, %v944_v60  ;;  %1299 = vrsqrt.f32 %v823_v4  ;;  %v761_v46 = vmul.f32 0.0078125, %v686_v45  ;;  %v2339_v4 = vld [vmem:[#allocation17_spill] sm:$0xff] }
 0x1db   :  { %v1290_v48 = vpop.eup %1289  ;;  %1149 = vst [vmem:[#allocation10 + $0x150] sm:$0xff] %v1085_v34  ;;  %v1016_v7 = vmul.f32 %v2052_v39, %v945_v6  ;;  %v824_v50 = vadd.f32 1e-05, %v760_v16  ;;  %v2340_v16 = vld [vmem:[#allocation18_spill] sm:$0xff] }
 0x1dc   :  { %v1292_v12 = vpop.eup %1291  ;;  %v1086_v24 = vadd.f32 %v2055_v37, %v1015_v8  ;;  %v946_v29 = vmul.f32 %v1290_v48, %v2333_v1  ;;  %v825_v52 = vadd.f32 1e-05, %v761_v46  ;;  %v688_v33 = vpop.xlane.xlu1 %687 }
 0x1dd   :  { %v690_v20 = vpop.xlane.xlu0 %689  ;;  %v1087_v47 = vadd.f32 %v2055_v37, %v1016_v7  ;;  %v947_v32 = vmul.f32 %v1292_v12, %v2334_v40  ;;  %1301 = vrsqrt.f32 %v824_v50  ;;  %v762_v18 = vmul.f32 0.0078125, %v688_v33 }
 0x1de   :  { %1150 = vst [vmem:[#allocation10 + $0x158] sm:$0xff] %v1086_v24  ;;  %v1017_v49 = vmul.f32 %v2052_v39, %v946_v29  ;;  %1303 = vrsqrt.f32 %v825_v52  ;;  %v763_v43 = vmul.f32 0.0078125, %v690_v20  ;;  %v2341_v52 = vld [vmem:[#allocation19_spill] sm:$0xff] }
 0x1df   :  { %v1294_v3 = vpop.eup %1293  ;;  %1151 = vst [vmem:[#allocation10 + $0x160] sm:$0xff] %v1087_v47  ;;  %v1018_v22 = vmul.f32 %v2052_v39, %v947_v32  ;;  %v826_v17 = vadd.f32 1e-05, %v762_v18  ;;  %v2342_v18 = vld [vmem:[#allocation20_spill] sm:$0xff] }
 0x1e0   :  { %v1296_v63 = vpop.eup %1295  ;;  %v1088_v56 = vadd.f32 %v2055_v37, %v1017_v49  ;;  %v948_v44 = vmul.f32 %v1294_v3, %v2335_v9  ;;  %v827_v21 = vadd.f32 1e-05, %v763_v43  ;;  %v692_v38 = vpop.xlane.xlu1 %691 }
 0x1e1   :  { %v694_v5 = vpop.xlane.xlu0 %693  ;;  %v1089_v61 = vadd.f32 %v2055_v37, %v1018_v22  ;;  %v949_v58 = vmul.f32 %v1296_v63, %v2336_v26  ;;  %1305 = vrsqrt.f32 %v826_v17  ;;  %v764_v35 = vmul.f32 0.0078125, %v692_v38 }
 0x1e2   :  { %1152 = vst [vmem:[#allocation10 + $0x168] sm:$0xff] %v1088_v56  ;;  %v1019_v53 = vmul.f32 %v2052_v39, %v948_v44  ;;  %1307 = vrsqrt.f32 %v827_v21  ;;  %v765_v2 = vmul.f32 0.0078125, %v694_v5  ;;  %v2343_v21 = vld [vmem:[#allocation21_spill] sm:$0xff] }
 0x1e3   :  { %v1298_v30 = vpop.eup %1297  ;;  %1153 = vst [vmem:[#allocation10 + $0x170] sm:$0xff] %v1089_v61  ;;  %v1020_v13 = vmul.f32 %v2052_v39, %v949_v58  ;;  %v828_v27 = vadd.f32 1e-05, %v764_v35  ;;  %v2344_v58 = vld [vmem:[#allocation22_spill] sm:$0xff] }
 0x1e4   :  { %v1300_v28 = vpop.eup %1299  ;;  %v1090_v54 = vadd.f32 %v2055_v37, %v1019_v53  ;;  %v950_v36 = vmul.f32 %v1298_v30, %v2337_v10  ;;  %v829_v55 = vadd.f32 1e-05, %v765_v2  ;;  %v696_v42 = vpop.xlane.xlu1 %695 }
 0x1e5   :  { %v698_v19 = vpop.xlane.xlu0 %697  ;;  %v1091_v25 = vadd.f32 %v2055_v37, %v1020_v13  ;;  %v951_v0 = vmul.f32 %v1300_v28, %v2338_v23  ;;  %1309 = vrsqrt.f32 %v828_v27  ;;  %v766_v15 = vmul.f32 0.0078125, %v696_v42  ;;  %v1327_v13 = vld [vmem:[#allocation7] ss:$0 sm:$0xff] }
 0x1e6   :  { %1154 = vst [vmem:[#allocation10 + $0x178] sm:$0xff] %v1090_v54  ;;  %v1021_v31 = vmul.f32 %v2052_v39, %v950_v36  ;;  %1311 = vrsqrt.f32 %v829_v55  ;;  %v767_v57 = vmul.f32 0.0078125, %v698_v19  ;;  %v2345_v36 = vld [vmem:[#allocation33_spill] sm:$0xff]  ;;  %v2346_v19 = vld [vmem:[#allocation23_spill] sm:$0xff] }
 0x1e7   :  { %v1302_v59 = vpop.eup %1301  ;;  %1155 = vst [vmem:[#allocation10 + $0x180] sm:$0xff] %v1091_v25  ;;  %v1022_v11 = vmul.f32 %v2052_v39, %v951_v0  ;;  %v830_v62 = vadd.f32 1e-05, %v766_v15 }
 0x1e8   :  { %v1304_v41 = vpop.eup %1303  ;;  %v1092_v60 = vadd.f32 %v2055_v37, %v1021_v31  ;;  %v952_v14 = vmul.f32 %v1302_v59, %v2339_v4  ;;  %v831_v45 = vadd.f32 1e-05, %v767_v57  ;;  %v700_v34 = vpop.xlane.xlu1 %699  ;;  %v1328_v31 = vld [vmem:[#allocation8] ss:$0 sm:$0xff]  ;;  %v2347_v59 = vld [vmem:[#allocation24_spill] sm:$0xff] }
 0x1e9   :  { %v702_v51 = vpop.xlane.xlu0 %701  ;;  %v1093_v6 = vadd.f32 %v2055_v37, %v1022_v11  ;;  %v953_v8 = vmul.f32 %v1304_v41, %v2340_v16  ;;  %1313 = vrsqrt.f32 %v830_v62  ;;  %v768_v46 = vmul.f32 0.0078125, %v700_v34  ;;  %v2348_v41 = vld [vmem:[#allocation25_spill] sm:$0xff] }
 0x1ea   :  { %1156 = vst [vmem:[#allocation10 + $0x188] sm:$0xff] %v1092_v60  ;;  %v1023_v48 = vmul.f32 %v2052_v39, %v952_v14  ;;  %1315 = vrsqrt.f32 %v831_v45  ;;  %v769_v7 = vmul.f32 0.0078125, %v702_v51  ;;  %v2349_v51 = vld [vmem:[#allocation34_spill] sm:$0xff] }
 0x1eb   :  { %v1306_v50 = vpop.eup %1305  ;;  %1157 = vst [vmem:[#allocation10 + $0x190] sm:$0xff] %v1093_v6  ;;  %v1024_v12 = vmul.f32 %v2052_v39, %v953_v8  ;;  %v832_v24 = vadd.f32 1e-05, %v768_v46  ;;  %v2350_v8 = vld [vmem:[#allocation35_spill] sm:$0xff] }
 0x1ec   :  { %v1308_v1 = vpop.eup %1307  ;;  %v1094_v29 = vadd.f32 %v2055_v37, %v1023_v48  ;;  %v954_v33 = vmul.f32 %v1306_v50, %v2341_v52  ;;  %v833_v20 = vadd.f32 1e-05, %v769_v7  ;;  %v704_v47 = vpop.xlane.xlu1 %703 }
 0x1ed   :  { %v706_v40 = vpop.xlane.xlu0 %705  ;;  %v1095_v32 = vadd.f32 %v2055_v37, %v1024_v12  ;;  %v955_v49 = vmul.f32 %v1308_v1, %v2342_v18  ;;  %1317 = vrsqrt.f32 %v832_v24  ;;  %v770_v43 = vmul.f32 0.0078125, %v704_v47  ;;  %v2351_v24 = vld [vmem:[#allocation26_spill] sm:$0xff] }
 0x1ee   :  { %1158 = vst [vmem:[#allocation10 + $0x198] sm:$0xff] %v1094_v29  ;;  %v1025_v3 = vmul.f32 %v2052_v39, %v954_v33  ;;  %1319 = vrsqrt.f32 %v833_v20  ;;  %v771_v22 = vmul.f32 0.0078125, %v706_v40 }
 0x1ef   :  { %v1310_v17 = vpop.eup %1309  ;;  %1159 = vst [vmem:[#allocation10 + $0x1a0] sm:$0xff] %v1095_v32  ;;  %v1026_v63 = vmul.f32 %v2052_v39, %v955_v49  ;;  %v834_v56 = vadd.f32 1e-05, %v770_v43 }
 0x1f0   :  { %v1312_v9 = vpop.eup %1311  ;;  %v1096_v44 = vadd.f32 %v2055_v37, %v1025_v3  ;;  %v956_v38 = vmul.f32 %v1310_v17, %v2343_v21  ;;  %v835_v5 = vadd.f32 1e-05, %v771_v22  ;;  %v708_v61 = vpop.xlane.xlu1 %707 }
 0x1f1   :  { %v1097_v26 = vadd.f32 %v2055_v37, %v1026_v63  ;;  %v957_v35 = vmul.f32 %v1312_v9, %v2344_v58  ;;  %1321 = vrsqrt.f32 %v834_v56  ;;  %v772_v53 = vmul.f32 0.0078125, %v708_v61 }
 0x1f2   :  { %1160 = vst [vmem:[#allocation10 + $0x1a8] sm:$0xff] %v1096_v44  ;;  %v1027_v2 = vmul.f32 %v2052_v39, %v956_v38  ;;  %1323 = vrsqrt.f32 %v835_v5 }
 0x1f3   :  { %v1314_v30 = vpop.eup %1313  ;;  %1161 = vst [vmem:[#allocation10 + $0x1b0] sm:$0xff] %v1097_v26  ;;  %v1028_v27 = vmul.f32 %v1327_v13, %v957_v35  ;;  %v836_v28 = vadd.f32 1e-05, %v772_v53 }
 0x1f4   :  { %v1316_v54 = vpop.eup %1315  ;;  %v1098_v10 = vadd.f32 %v2055_v37, %v1027_v2  ;;  %v958_v55 = vmul.f32 %v1314_v30, %v2345_v36 }
 0x1f5   :  { %v1099_v42 = vadd.f32 %v2055_v37, %v1028_v27  ;;  %v959_v25 = vmul.f32 %v1316_v54, %v2346_v19  ;;  %1325 = vrsqrt.f32 %v836_v28 }
 0x1f6   :  { %1162 = vst [vmem:[#allocation10 + $0x1b8] sm:$0xff] %v1098_v10  ;;  %v1029_v23 = vmul.f32 %v1327_v13, %v958_v55 }
 0x1f7   :  { %v1318_v0 = vpop.eup %1317  ;;  %1163 = vst [vmem:[#allocation10 + $0x1c0] sm:$0xff] %v1099_v42  ;;  %v1030_v39 = vmul.f32 %v1327_v13, %v959_v25 }
 0x1f8   :  { %v1320_v15 = vpop.eup %1319  ;;  %v1100_v57 = vadd.f32 %v1328_v31, %v1029_v23  ;;  %v960_v11 = vmul.f32 %v1318_v0, %v2347_v59 }
 0x1f9   :  { %v1101_v62 = vadd.f32 %v1328_v31, %v1030_v39  ;;  %v961_v60 = vmul.f32 %v1320_v15, %v2348_v41 }
 0x1fa   :  { %1164 = vst [vmem:[#allocation10 + $0x1c8] sm:$0xff] %v1100_v57  ;;  %v1031_v4 = vmul.f32 %v1327_v13, %v960_v11 }
 0x1fb   :  { %v1322_v14 = vpop.eup %1321  ;;  %1165 = vst [vmem:[#allocation10 + $0x1d0] sm:$0xff] %v1101_v62  ;;  %v1032_v37 = vmul.f32 %v1327_v13, %v961_v60 }
 0x1fc   :  { %v1324_v45 = vpop.eup %1323  ;;  %v1102_v34 = vadd.f32 %v1328_v31, %v1031_v4  ;;  %v962_v6 = vmul.f32 %v1322_v14, %v2349_v51 }
 0x1fd   :  { %v1103_v16 = vadd.f32 %v1328_v31, %v1032_v37  ;;  %v963_v46 = vmul.f32 %v1324_v45, %v2350_v8 }
 0x1fe   :  { %1166 = vst [vmem:[#allocation10 + $0x1d8] sm:$0xff] %v1102_v34  ;;  %v1033_v48 = vmul.f32 %v1327_v13, %v962_v6 }
 0x1ff   :  { %v1326_v7 = vpop.eup %1325  ;;  %1167 = vst [vmem:[#allocation10 + $0x1e0] sm:$0xff] %v1103_v16  ;;  %v1034_v50 = vmul.f32 %v1327_v13, %v963_v46 }
 0x200   :  { %v1104_v12 = vadd.f32 %v1328_v31, %v1033_v48  ;;  %v964_v1 = vmul.f32 %v1326_v7, %v2351_v24 }
 0x201   :  { %v1105_v29 = vadd.f32 %v1328_v31, %v1034_v50 }
 0x202   :  { %1168 = vst [vmem:[#allocation10 + $0x1e8] sm:$0xff] %v1104_v12  ;;  %v1035_v52 = vmul.f32 %v1327_v13, %v964_v1 }
 0x203   :  { %1169 = vst [vmem:[#allocation10 + $0x1f0] sm:$0xff] %v1105_v29 }
 0x204   :  { %v1106_v33 = vadd.f32 %v1328_v31, %v1035_v52 }
 0x206   :  { %1170 = vst [vmem:[#allocation10 + $0x1f8] sm:$0xff] %v1106_v33 }
 0x207   :  { %1428 = shalt.err (!%p1425_p8)
}
 0x208   :  { %s1429_s17 = scalar_lea.hbm %s2252_s4, 8192 }
 0x209   :  { %p1430_p9 = scmp.ne.s32.totalorder %s2252_s4, %s1429_s17  ;;  %p1433_p10 = scmp.lt.u32.totalorder %s1429_s17, %s2252_s4 }
 0x20b   :  { %p1435_p11 = pnand %p1433_p10, %p1430_p9 }
 0x20d   :  { %1438 = shalt.err (!%p1435_p11)
}
 0x20e   :  { %1182 = dma.vmem_to_hbm [thread:$0]  %s1177_s13, 8192, %s2252_s4, [#allocation4], %s1449_s27, %s1449_s27, %s1450_s28  }
 0x20f   :  { %1445 = dma.done.wait [#allocation4], 8192  }
 0x210   :  { %1446 = vsyncadd [#allocation4], 4294959104 }
 0x211   :  { %1186 = vsyncpa [#allocation3], 1 }
 0x212   :  { %1187 = vsyncpa [#allocation6], 1 }
 0x213   :  { %1188 = vsyncpa [#allocation9], 1 }
 0x214   :  { %1189 = vsyncpa [#allocation4], 1 }

</bundles_post_ra>
